<compile_context>
chip_gen: v7x
topology: tpu7x:2x2x1
jax: 0.10.0
libtpu: 0.0.40
codegen_flags: <defaults>
</compile_context>

<pallas_src>
import functools
import math

import jax
import jax.numpy as jnp
from jax.experimental import pallas as pl
from jax.experimental.pallas import tpu as pltpu

ACT_DTYPE = jnp.bfloat16          # MXU operand / activation dtype


# ----------------------------------------------------------------------------
# Generation-aware VMEM budget & tile helpers
# ----------------------------------------------------------------------------

@functools.lru_cache(maxsize=None)
def _vmem_limit():
    """Scoped-VMEM budget: ~3/4 of physical, capped at 96 MiB (48 MiB on v7x)."""
    try:
        cap = int(pltpu.get_tpu_info().vmem_capacity_bytes)
    except Exception:
        cap = 64 * 1024 * 1024          # conservative (v7x-sized) default
    return min((cap * 3) // 4, 96 * 1024 * 1024)


def _pick_tile(dim, preferred, minimum):
    """Largest power-of-two tile <= preferred that divides dim, else full dim."""
    if dim <= preferred:
        return dim
    t = preferred
    while t >= minimum:
        if dim % t == 0:
            return t
        t //= 2
    return dim


def _row_tile_pref():
    return 512 if _vmem_limit() >= (64 << 20) else 256


# ----------------------------------------------------------------------------
# Linear:  o = act(x @ w + b)          (resident-weight path + tiled fallback)
# ----------------------------------------------------------------------------

def _linear_resident_kernel(x_ref, w_ref, b_ref, o_ref, *, activation):
    y = jnp.dot(x_ref[...], w_ref[...], preferred_element_type=jnp.float32)
    y = y + b_ref[...]                                  # bias in f32
    if activation == "gelu":
        # TODO(synk): exact erf GELU would match HF BERT precisely.
        y = jax.nn.gelu(y, approximate=True)
    o_ref[...] = y.astype(o_ref.dtype)


def _linear_tiled_kernel(x_ref, w_ref, b_ref, o_ref, acc_ref, *, activation):
    @pl.when(pl.program_id(2) == 0)
    def _init():
        acc_ref[...] = jnp.zeros_like(acc_ref)

    acc_ref[...] += jnp.dot(x_ref[...], w_ref[...],
                            preferred_element_type=jnp.float32)

    @pl.when(pl.program_id(2) == pl.num_programs(2) - 1)
    def _finalize():
        y = acc_ref[...] + b_ref[...]
        if activation == "gelu":
            y = jax.nn.gelu(y, approximate=True)
        o_ref[...] = y.astype(o_ref.dtype)


def _resident_row_tile(M, K, N, x_bytes, w_bytes, out_bytes, extra_row_bytes=0):
    """Pick a row tile so W (1x) + double-buffered x/out/extras fit the budget."""
    budget = int(_vmem_limit() * 0.8)
    tm = _pick_tile(M, _row_tile_pref(), 8)

    def need(t):
        return (K * N * w_bytes + 2 * t * K * x_bytes + 2 * t * N * out_bytes
                + 2 * t * extra_row_bytes + 4 * N * 4)

    while (need(tm) > budget and tm % 2 == 0 and (tm // 2) % 8 == 0
           and M % (tm // 2) == 0):
        tm //= 2
    return (tm, True) if need(tm) <= budget else (tm, False)


def linear(x, w, b, activation=None, out_dtype=None):
    M, K = x.shape
    K2, N = w.shape
    assert K == K2
    out_dtype = out_dtype or x.dtype
    o_bytes = jnp.dtype(out_dtype).itemsize
    bias = b.astype(jnp.float32).reshape(1, N)

    cost = pl.CostEstimate(
        flops=2 * M * N * K,
        transcendentals=(M * N) if activation == "gelu" else 0,
        bytes_accessed=(M * K * x.dtype.itemsize + K * N * w.dtype.itemsize
                        + M * N * o_bytes + N * 4),
    )

    tm, fits = _resident_row_tile(M, K, N, x.dtype.itemsize, w.dtype.itemsize,
                                  o_bytes)
    if fits:
        # Weight fully resident in VMEM; grid only over rows of x.
        return pl.pallas_call(
            functools.partial(_linear_resident_kernel, activation=activation),
            out_shape=jax.ShapeDtypeStruct((M, N), out_dtype),
            grid=(M // tm,),
            in_specs=[
                pl.BlockSpec((tm, K), lambda i: (i, 0)),
                pl.BlockSpec((K, N), lambda i: (0, 0)),
                pl.BlockSpec((1, N), lambda i: (0, 0)),
            ],
            out_specs=pl.BlockSpec((tm, N), lambda i: (i, 0)),
            compiler_params=pltpu.CompilerParams(
                dimension_semantics=("parallel",),
                vmem_limit_bytes=_vmem_limit()),
            cost_estimate=cost,
        )(x, w, bias)

    # Fallback: classic 3-axis tiling with f32 accumulator (huge weights only).
    tn = _pick_tile(N, 256, 128)
    tk = _pick_tile(K, 512, 128)
    return pl.pallas_call(
        functools.partial(_linear_tiled_kernel, activation=activation),
        out_shape=jax.ShapeDtypeStruct((M, N), out_dtype),
        grid=(M // tm, N // tn, K // tk),
        in_specs=[
            pl.BlockSpec((tm, tk), lambda i, j, k: (i, k)),
            pl.BlockSpec((tk, tn), lambda i, j, k: (k, j)),
            pl.BlockSpec((1, tn), lambda i, j, k: (0, j)),
        ],
        out_specs=pl.BlockSpec((tm, tn), lambda i, j, k: (i, j)),
        scratch_shapes=[pltpu.VMEM((tm, tn), jnp.float32)],
        compiler_params=pltpu.CompilerParams(
            dimension_semantics=("parallel", "parallel", "arbitrary"),
            vmem_limit_bytes=_vmem_limit()),
        cost_estimate=cost,
    )(x, w, bias)


# ----------------------------------------------------------------------------
# Linear with fused residual-add + LayerNorm epilogue  (wo / w2 projections)
# ----------------------------------------------------------------------------

def _linear_res_ln_kernel(x_ref, w_ref, b_ref, r_ref, g_ref, bb_ref, o_ref, *, eps):
    y = jnp.dot(x_ref[...], w_ref[...], preferred_element_type=jnp.float32)
    y = y + b_ref[...] + r_ref[...].astype(jnp.float32)      # bias + residual (f32)
    mean = jnp.mean(y, axis=-1, keepdims=True)
    var = jnp.mean(jnp.square(y - mean), axis=-1, keepdims=True)
    y = (y - mean) * jax.lax.rsqrt(var + eps)
    o_ref[...] = (y * g_ref[...] + bb_ref[...]).astype(o_ref.dtype)


def linear_residual_layernorm(x, w, b, residual, gamma, beta, eps=1e-12,
                              out_dtype=None):
    """act-free linear, then (y + residual) -> LayerNorm, all in one epilogue."""
    M, K = x.shape
    K2, N = w.shape
    assert K == K2 and residual.shape == (M, N)
    out_dtype = out_dtype or x.dtype
    o_bytes = jnp.dtype(out_dtype).itemsize

    tm, fits = _resident_row_tile(M, K, N, x.dtype.itemsize, w.dtype.itemsize,
                                  o_bytes,
                                  extra_row_bytes=N * residual.dtype.itemsize)
    if not fits:
        y = linear(x, w, b, out_dtype=out_dtype)
        return add_layernorm(y, residual, gamma, beta, eps=eps,
                             out_dtype=out_dtype)

    bias = b.astype(jnp.float32).reshape(1, N)
    g = gamma.astype(jnp.float32).reshape(1, N)
    bb = beta.astype(jnp.float32).reshape(1, N)
    cost = pl.CostEstimate(
        flops=2 * M * N * K + 8 * M * N,
        transcendentals=M,
        bytes_accessed=(M * K * x.dtype.itemsize + K * N * w.dtype.itemsize
                        + 2 * M * N * o_bytes + 3 * N * 4),
    )
    return pl.pallas_call(
        functools.partial(_linear_res_ln_kernel, eps=eps),
        out_shape=jax.ShapeDtypeStruct((M, N), out_dtype),
        grid=(M // tm,),
        in_specs=[
            pl.BlockSpec((tm, K), lambda i: (i, 0)),
            pl.BlockSpec((K, N), lambda i: (0, 0)),
            pl.BlockSpec((1, N), lambda i: (0, 0)),
            pl.BlockSpec((tm, N), lambda i: (i, 0)),
            pl.BlockSpec((1, N), lambda i: (0, 0)),
            pl.BlockSpec((1, N), lambda i: (0, 0)),
        ],
        out_specs=pl.BlockSpec((tm, N), lambda i: (i, 0)),
        compiler_params=pltpu.CompilerParams(
            dimension_semantics=("parallel",),
            vmem_limit_bytes=_vmem_limit()),
        cost_estimate=cost,
    )(x, w, bias, residual, g, bb)


# ----------------------------------------------------------------------------
# Row-tiled LayerNorm (embeddings) and add+LayerNorm (fallback path)
# ----------------------------------------------------------------------------

def _ln_math(x_f32, g_ref, b_ref, o_ref, eps):
    mean = jnp.mean(x_f32, axis=-1, keepdims=True)
    var = jnp.mean(jnp.square(x_f32 - mean), axis=-1, keepdims=True)
    y = (x_f32 - mean) * jax.lax.rsqrt(var + eps)
    o_ref[...] = (y * g_ref[...] + b_ref[...]).astype(o_ref.dtype)


def _layernorm_kernel(x_ref, g_ref, b_ref, o_ref, *, eps):
    _ln_math(x_ref[...].astype(jnp.float32), g_ref, b_ref, o_ref, eps)


def _add_layernorm_kernel(x_ref, r_ref, g_ref, b_ref, o_ref, *, eps):
    x = x_ref[...].astype(jnp.float32) + r_ref[...].astype(jnp.float32)
    _ln_math(x, g_ref, b_ref, o_ref, eps)


def _ln_call(kernel, arrays, M, H, out_dtype, eps):
    tm = _pick_tile(M, _row_tile_pref(), 8)
    row_spec = pl.BlockSpec((tm, H), lambda i: (i, 0))
    vec_spec = pl.BlockSpec((1, H), lambda i: (0, 0))
    n_rows = len(arrays) - 2
    return pl.pallas_call(
        functools.partial(kernel, eps=eps),
        out_shape=jax.ShapeDtypeStruct((M, H), out_dtype),
        grid=(M // tm,),
        in_specs=[row_spec] * n_rows + [vec_spec, vec_spec],
        out_specs=row_spec,
        compiler_params=pltpu.CompilerParams(
            dimension_semantics=("parallel",),
            vmem_limit_bytes=_vmem_limit()),
    )(*arrays)


def layernorm(x, gamma, beta, eps=1e-12, out_dtype=None):
    M, H = x.shape
    out_dtype = out_dtype or x.dtype
    g = gamma.astype(jnp.float32).reshape(1, H)
    b = beta.astype(jnp.float32).reshape(1, H)
    return _ln_call(_layernorm_kernel, (x, g, b), M, H, out_dtype, eps)


def add_layernorm(x, residual, gamma, beta, eps=1e-12, out_dtype=None):
    M, H = x.shape
    out_dtype = out_dtype or x.dtype
    g = gamma.astype(jnp.float32).reshape(1, H)
    b = beta.astype(jnp.float32).reshape(1, H)
    return _ln_call(_add_layernorm_kernel, (x, residual, g, b), M, H, out_dtype, eps)


# ----------------------------------------------------------------------------
# Multi-head attention straight from the packed (B*S, 3H) QKV matrix
# ----------------------------------------------------------------------------

def _attn_one_head(q, k, v, mask, scale):
    s = jax.lax.dot_general(q, k, (((1,), (1,)), ((), ())),
                            preferred_element_type=jnp.float32) * scale
    s = s + mask
    s = s - jnp.max(s, axis=-1, keepdims=True)
    p = jnp.exp(s)
    p = p * pl.reciprocal(jnp.sum(p, axis=-1, keepdims=True), approx=True)
    return jnp.dot(p.astype(v.dtype), v, preferred_element_type=jnp.float32)


def _attn_grouped_kernel(q_ref, k_ref, v_ref, mask_ref, o_ref, *, scale, hpb, dh):
    q_all = q_ref[...]          # (tq, hpb*dh) bf16
    k_all = k_ref[...]          # (S,  hpb*dh)
    v_all = v_ref[...]
    mask = mask_ref[...]        # (1, S) additive f32
    outs = []
    for h in range(hpb):        # static loop over heads in this lane-dense group
        sl = slice(h * dh, (h + 1) * dh)
        outs.append(_attn_one_head(q_all[:, sl], k_all[:, sl], v_all[:, sl],
                                   mask, scale))
    o_ref[...] = jnp.concatenate(outs, axis=-1).astype(o_ref.dtype)


def _attn_fullrow_kernel(qkv_ref, mask_ref, o_ref, *, scale, nh, dh, hidden):
    qkv = qkv_ref[...]          # (S, 3H)
    mask = mask_ref[...]        # (1, S)
    outs = []
    for h in range(nh):
        q = qkv[:, h * dh:(h + 1) * dh]
        k = qkv[:, hidden + h * dh: hidden + (h + 1) * dh]
        v = qkv[:, 2 * hidden + h * dh: 2 * hidden + (h + 1) * dh]
        outs.append(_attn_one_head(q, k, v, mask, scale))
    o_ref[...] = jnp.concatenate(outs, axis=-1).astype(o_ref.dtype)


def multi_head_attention(qkv, ext_mask, *, num_heads, head_dim, hidden, scale,
                         out_dtype):
    """qkv: (B*S, 3H) packed; ext_mask: (B, 1, S) additive -> (B*S, H)."""
    BS = qkv.shape[0]
    B = ext_mask.shape[0]
    S = BS // B

    # Lane-dense head grouping: group width must be a multiple of 128 dividing H.
    if head_dim % 128 == 0:
        hpb = 1
    elif 128 % head_dim == 0:
        hpb = 128 // head_dim
    else:
        hpb = 0
    wg = hpb * head_dim
    grouped_ok = (hpb > 0 and num_heads % hpb == 0 and hidden % wg == 0)

    cost = pl.CostEstimate(
        flops=4 * B * num_heads * S * S * head_dim,
        transcendentals=B * num_heads * S * S,
        bytes_accessed=4 * B * S * hidden * qkv.dtype.itemsize + B * S * 4,
    )
    cp = pltpu.CompilerParams(
        dimension_semantics=("parallel",) * (3 if grouped_ok else 1),
        vmem_limit_bytes=_vmem_limit())

    if grouped_ok:
        n_hg = num_heads // hpb
        tq = _pick_tile(S, 256, 8)          # query-row tile bounds vreg pressure
        n_qt = S // tq
        kv_col0 = hidden // wg              # block-column offset of K columns
        q_spec = pl.BlockSpec((tq, wg), lambda b, g, qi: (b * n_qt + qi, g))
        k_spec = pl.BlockSpec((S, wg), lambda b, g, qi: (b, kv_col0 + g))
        v_spec = pl.BlockSpec((S, wg), lambda b, g, qi: (b, 2 * kv_col0 + g))
        m_spec = pl.BlockSpec((None, 1, S), lambda b, g, qi: (b, 0, 0))
        o_spec = pl.BlockSpec((tq, wg), lambda b, g, qi: (b * n_qt + qi, g))
        return pl.pallas_call(
            functools.partial(_attn_grouped_kernel, scale=scale, hpb=hpb,
                              dh=head_dim),
            out_shape=jax.ShapeDtypeStruct((BS, hidden), out_dtype),
            grid=(B, n_hg, n_qt),
            in_specs=[q_spec, k_spec, v_spec, m_spec],
            out_specs=o_spec,
            compiler_params=cp,
            cost_estimate=cost,
        )(qkv, qkv, qkv, ext_mask)

    # Small-config fallback: one batch row-block (S, 3H) per program.
    return pl.pallas_call(
        functools.partial(_attn_fullrow_kernel, scale=scale, nh=num_heads,
                          dh=head_dim, hidden=hidden),
        out_shape=jax.ShapeDtypeStruct((BS, hidden), out_dtype),
        grid=(B,),
        in_specs=[
            pl.BlockSpec((S, 3 * hidden), lambda b: (b, 0)),
            pl.BlockSpec((None, 1, S), lambda b: (b, 0, 0)),
        ],
        out_specs=pl.BlockSpec((S, hidden), lambda b: (b, 0)),
        compiler_params=cp,
        cost_estimate=cost,
    )(qkv, ext_mask)


# ----------------------------------------------------------------------------
# Parameter construction (deterministic, synthetic BERT weights)
# ----------------------------------------------------------------------------

def init_params(key, *, vocab_size, max_pos, type_vocab, hidden, num_heads,
                intermediate, num_layers, num_labels):
    assert hidden % num_heads == 0

    def normal(k, shape, dtype=ACT_DTYPE):
        return (0.02 * jax.random.normal(k, shape, dtype=jnp.float32)).astype(dtype)

    keys = jax.random.split(key, 4 + num_layers)
    params = {
        "word_emb": normal(keys[0], (vocab_size, hidden), jnp.float32),
        "pos_emb": normal(keys[1], (max_pos, hidden), jnp.float32),
        "type_emb": normal(keys[2], (type_vocab, hidden), jnp.float32),
        "emb_ln_g": jnp.ones((hidden,), jnp.float32),
        "emb_ln_b": jnp.zeros((hidden,), jnp.float32),
        "layers": [],
    }
    layer_keys = jax.random.split(keys[3], num_layers + 1)
    for li in range(num_layers):
        lk = jax.random.split(layer_keys[li], 4)
        params["layers"].append({
            "w_qkv": normal(lk[0], (hidden, 3 * hidden)),    # fused QKV (H, 3H)
            "b_qkv": jnp.zeros((3 * hidden,), jnp.float32),
            "wo": normal(lk[1], (hidden, hidden)),
            "bo": jnp.zeros((hidden,), jnp.float32),
            "ln1_g": jnp.ones((hidden,), jnp.float32),
            "ln1_b": jnp.zeros((hidden,), jnp.float32),
            "w1": normal(lk[2], (hidden, intermediate)),
            "b1": jnp.zeros((intermediate,), jnp.float32),
            "w2": normal(lk[3], (intermediate, hidden)),
            "b2": jnp.zeros((hidden,), jnp.float32),
            "ln2_g": jnp.ones((hidden,), jnp.float32),
            "ln2_b": jnp.zeros((hidden,), jnp.float32),
        })
    cls_key = layer_keys[num_layers]
    params["cls_w"] = normal(cls_key, (hidden, num_labels), jnp.float32)
    params["cls_b"] = jnp.zeros((num_labels,), jnp.float32)
    return params


# ----------------------------------------------------------------------------
# FinetuneProbe.forward
# ----------------------------------------------------------------------------

def finetune_probe_forward(params, ids, mask, token_type_ids, *, num_heads):
    """ids, mask, token_type_ids: (B, S) int32 -> logits (B, num_labels)."""
    B, S = ids.shape
    H = params["word_emb"].shape[1]
    Dh = H // num_heads
    scale = 1.0 / math.sqrt(Dh)

    # --- embeddings (table gathers stay XLA glue) ---
    pos_ids = jnp.arange(S)
    emb = (params["word_emb"][ids]
           + params["pos_emb"][pos_ids][None, :, :]
           + params["type_emb"][token_type_ids])                     # (B, S, H) f32
    x2 = layernorm(emb.reshape(B * S, H),
                   params["emb_ln_g"], params["emb_ln_b"],
                   out_dtype=ACT_DTYPE)                              # (B*S, H) bf16

    # Extended additive attention mask, as in HF BERT: (1 - mask) * -10000
    ext_mask = (1.0 - mask.astype(jnp.float32))[:, None, :] * -10000.0   # (B, 1, S)

    for layer in params["layers"]:
        # --- self-attention: fused QKV projection, attention reads it packed ---
        qkv = linear(x2, layer["w_qkv"], layer["b_qkv"])             # (B*S, 3H)
        ctx = multi_head_attention(qkv, ext_mask, num_heads=num_heads,
                                   head_dim=Dh, hidden=H, scale=scale,
                                   out_dtype=ACT_DTYPE)              # (B*S, H)
        # output projection fused with residual-add + LayerNorm epilogue
        x2 = linear_residual_layernorm(ctx, layer["wo"], layer["bo"],
                                       x2, layer["ln1_g"], layer["ln1_b"])

        # --- feed-forward; second matmul fused with residual-add + LayerNorm ---
        h = linear(x2, layer["w1"], layer["b1"], activation="gelu")
        x2 = linear_residual_layernorm(h, layer["w2"], layer["b2"],
                                       x2, layer["ln2_g"], layer["ln2_b"])

    cls_output = x2.reshape(B, S, H)[:, 0, :]                        # (B, H)

    # Tiny classifier head: plain XLA matmul (pallas_call would be pure overhead).
    logits = (cls_output.astype(jnp.float32) @ params["cls_w"].astype(jnp.float32)
              + params["cls_b"])
    return logits


# ----------------------------------------------------------------------------

if __name__ == "__main__":
    # Small, forward-consistent configuration.
    B, S = 2, 8
    HIDDEN, NUM_HEADS, INTERMEDIATE, NUM_LAYERS = 32, 4, 64, 2
    VOCAB, MAX_POS, TYPE_VOCAB, NUM_LABELS = 50, 16, 2, 3

    key = jax.random.PRNGKey(0)
    pkey, ikey = jax.random.split(key)
    params = init_params(pkey, vocab_size=VOCAB, max_pos=MAX_POS,
                         type_vocab=TYPE_VOCAB, hidden=HIDDEN,
                         num_heads=NUM_HEADS, intermediate=INTERMEDIATE,
                         num_layers=NUM_LAYERS, num_labels=NUM_LABELS)

    ids = jax.random.randint(ikey, (B, S), 0, VOCAB, dtype=jnp.int32)
    mask = jnp.ones((B, S), dtype=jnp.int32).at[1, 6:].set(0)   # 2nd example padded
    token_type_ids = jnp.zeros((B, S), dtype=jnp.int32)

    # num_heads is STATIC (baked via partial), never a traced pytree leaf.
    fwd = jax.jit(functools.partial(finetune_probe_forward, num_heads=NUM_HEADS))
    logits = fwd(params, ids, mask, token_type_ids)
    jax.block_until_ready(logits)
    assert logits.shape == (B, NUM_LABELS)
    assert bool(jnp.all(jnp.isfinite(logits)))
    print("KERNEL_OK")
</pallas_src>

<mosaic_0001>
module attributes {stable_mosaic.version = 11 : i64} {
  func.func @_linear_resident_kernel(%arg0: i32, %arg1: memref<16x32xbf16, #tpu.memory_space<vmem>>, %arg2: memref<32x96xbf16, #tpu.memory_space<vmem>>, %arg3: memref<1x96xf32, #tpu.memory_space<vmem>>, %arg4: memref<16x96xbf16, #tpu.memory_space<vmem>>) attributes {dimension_semantics = [#tpu.dimension_semantics<parallel>], iteration_bounds = array<i64: 1>, scalar_prefetch = 0 : i64, scratch_operands = 0 : i64, tpu.core_type = #tpu.core_type<tc>, window_params = [{transform_indices = @transform_0, window_bounds = array<i64: 16, 32>}, {pipeline_mode = #tpu.pipeline_mode<synchronous>, transform_indices = @transform_1, window_bounds = array<i64: 32, 96>}, {pipeline_mode = #tpu.pipeline_mode<synchronous>, transform_indices = @transform_2, window_bounds = array<i64: 1, 96>}, {transform_indices = @transform_3, window_bounds = array<i64: 16, 96>}]} {
    %c0 = arith.constant 0 : index
    %c0_0 = arith.constant 0 : index
    %0 = vector.load %arg1[%c0, %c0_0] : memref<16x32xbf16, #tpu.memory_space<vmem>>, vector<16x32xbf16>
    %c0_1 = arith.constant 0 : index
    %c0_2 = arith.constant 0 : index
    %1 = vector.load %arg2[%c0_1, %c0_2] : memref<32x96xbf16, #tpu.memory_space<vmem>>, vector<32x96xbf16>
    %cst = arith.constant dense<0.000000e+00> : vector<16x96xf32>
    %2 = tpu.matmul %0, %1, %cst {dimension_numbers = #tpu.dot_dimension_numbers<[1], [0], [0], [1], [0, 0, 1, 1], [], []>} : vector<16x32xbf16>, vector<32x96xbf16>, vector<16x96xf32> -> vector<16x96xf32>
    %c0_3 = arith.constant 0 : index
    %c0_4 = arith.constant 0 : index
    %3 = vector.load %arg3[%c0_3, %c0_4] : memref<1x96xf32, #tpu.memory_space<vmem>>, vector<1x96xf32>
    %4 = vector.broadcast %3 : vector<1x96xf32> to vector<16x96xf32>
    %5 = arith.addf %2, %4 : vector<16x96xf32>
    %6 = arith.truncf %5 : vector<16x96xf32> to vector<16x96xbf16>
    %c0_5 = arith.constant 0 : index
    %c0_6 = arith.constant 0 : index
    %7 = vector.load %arg4[%c0_5, %c0_6] : memref<16x96xbf16, #tpu.memory_space<vmem>>, vector<16x96xbf16>
    tpu.vector_store %arg4[%c0_5, %c0_6], %6 {strides = array<i32>} : memref<16x96xbf16, #tpu.memory_space<vmem>>, vector<16x96xbf16>,
    return
  }
  func.func @transform_0(%arg0: i32) -> (i32, i32) {
    %c0_i32 = arith.constant 0 : i32
    %c0_i32_0 = arith.constant 0 : i32
    return %arg0, %c0_i32 : i32, i32
  }
  func.func @transform_1(%arg0: i32) -> (i32, i32) {
    %c0_i32 = arith.constant 0 : i32
    %c0_i32_0 = arith.constant 0 : i32
    %c0_i32_1 = arith.constant 0 : i32
    return %c0_i32, %c0_i32_0 : i32, i32
  }
  func.func @transform_2(%arg0: i32) -> (i32, i32) {
    %c0_i32 = arith.constant 0 : i32
    %c0_i32_0 = arith.constant 0 : i32
    %c0_i32_1 = arith.constant 0 : i32
    return %c0_i32, %c0_i32_0 : i32, i32
  }
  func.func @transform_3(%arg0: i32) -> (i32, i32) {
    %c0_i32 = arith.constant 0 : i32
    %c0_i32_0 = arith.constant 0 : i32
    return %arg0, %c0_i32 : i32, i32
  }
}

module attributes {stable_mosaic.version = 11 : i64} {
  func.func @_layernorm_kernel(%arg0: i32, %arg1: memref<16x32xf32, #tpu.memory_space<vmem>>, %arg2: memref<1x32xf32, #tpu.memory_space<vmem>>, %arg3: memref<1x32xf32, #tpu.memory_space<vmem>>, %arg4: memref<16x32xbf16, #tpu.memory_space<vmem>>) attributes {dimension_semantics = [#tpu.dimension_semantics<parallel>], iteration_bounds = array<i64: 1>, scalar_prefetch = 0 : i64, scratch_operands = 0 : i64, tpu.core_type = #tpu.core_type<tc>, window_params = [{transform_indices = @transform_0, window_bounds = array<i64: 16, 32>}, {pipeline_mode = #tpu.pipeline_mode<synchronous>, transform_indices = @transform_1, window_bounds = array<i64: 1, 32>}, {pipeline_mode = #tpu.pipeline_mode<synchronous>, transform_indices = @transform_2, window_bounds = array<i64: 1, 32>}, {transform_indices = @transform_3, window_bounds = array<i64: 16, 32>}]} {
    %c0 = arith.constant 0 : index
    %c0_0 = arith.constant 0 : index
    %0 = vector.load %arg1[%c0, %c0_0] : memref<16x32xf32, #tpu.memory_space<vmem>>, vector<16x32xf32>
    %cst = arith.constant dense<0.000000e+00> : vector<16xf32>
    %1 = vector.multi_reduction <add>, %0, %cst [1] : vector<16x32xf32> to vector<16xf32>
    %2 = vector.shape_cast %1 : vector<16xf32> to vector<16x1xf32>
    %cst_1 = arith.constant 3.200000e+01 : f32
    %3 = vector.broadcast %cst_1 : f32 to vector<16x1xf32>
    %4 = arith.divf %2, %3 : vector<16x1xf32>
    %5 = vector.broadcast %4 : vector<16x1xf32> to vector<16x32xf32>
    %6 = arith.subf %0, %5 : vector<16x32xf32>
    %7 = arith.mulf %6, %6 : vector<16x32xf32>
    %cst_2 = arith.constant dense<0.000000e+00> : vector<16xf32>
    %8 = vector.multi_reduction <add>, %7, %cst_2 [1] : vector<16x32xf32> to vector<16xf32>
    %9 = vector.shape_cast %8 : vector<16xf32> to vector<16x1xf32>
    %cst_3 = arith.constant 3.200000e+01 : f32
    %10 = vector.broadcast %cst_3 : f32 to vector<16x1xf32>
    %11 = arith.divf %9, %10 : vector<16x1xf32>
    %12 = vector.broadcast %4 : vector<16x1xf32> to vector<16x32xf32>
    %13 = arith.subf %0, %12 : vector<16x32xf32>
    %cst_4 = arith.constant 9.99999996E-13 : f32
    %14 = vector.broadcast %cst_4 : f32 to vector<16x1xf32>
    %15 = arith.addf %11, %14 : vector<16x1xf32>
    %16 = math.rsqrt %15 : vector<16x1xf32>
    %17 = vector.broadcast %16 : vector<16x1xf32> to vector<16x32xf32>
    %18 = arith.mulf %13, %17 : vector<16x32xf32>
    %c0_5 = arith.constant 0 : index
    %c0_6 = arith.constant 0 : index
    %19 = vector.load %arg2[%c0_5, %c0_6] : memref<1x32xf32, #tpu.memory_space<vmem>>, vector<1x32xf32>
    %20 = vector.broadcast %19 : vector<1x32xf32> to vector<16x32xf32>
    %21 = arith.mulf %18, %20 : vector<16x32xf32>
    %c0_7 = arith.constant 0 : index
    %c0_8 = arith.constant 0 : index
    %22 = vector.load %arg3[%c0_7, %c0_8] : memref<1x32xf32, #tpu.memory_space<vmem>>, vector<1x32xf32>
    %23 = vector.broadcast %22 : vector<1x32xf32> to vector<16x32xf32>
    %24 = arith.addf %21, %23 : vector<16x32xf32>
    %25 = arith.truncf %24 : vector<16x32xf32> to vector<16x32xbf16>
    %c0_9 = arith.constant 0 : index
    %c0_10 = arith.constant 0 : index
    %26 = vector.load %arg4[%c0_9, %c0_10] : memref<16x32xbf16, #tpu.memory_space<vmem>>, vector<16x32xbf16>
    tpu.vector_store %arg4[%c0_9, %c0_10], %25 {strides = array<i32>} : memref<16x32xbf16, #tpu.memory_space<vmem>>, vector<16x32xbf16>,
    return
  }
  func.func @transform_0(%arg0: i32) -> (i32, i32) {
    %c0_i32 = arith.constant 0 : i32
    %c0_i32_0 = arith.constant 0 : i32
    return %arg0, %c0_i32 : i32, i32
  }
  func.func @transform_1(%arg0: i32) -> (i32, i32) {
    %c0_i32 = arith.constant 0 : i32
    %c0_i32_0 = arith.constant 0 : i32
    %c0_i32_1 = arith.constant 0 : i32
    return %c0_i32, %c0_i32_0 : i32, i32
  }
  func.func @transform_2(%arg0: i32) -> (i32, i32) {
    %c0_i32 = arith.constant 0 : i32
    %c0_i32_0 = arith.constant 0 : i32
    %c0_i32_1 = arith.constant 0 : i32
    return %c0_i32, %c0_i32_0 : i32, i32
  }
  func.func @transform_3(%arg0: i32) -> (i32, i32) {
    %c0_i32 = arith.constant 0 : i32
    %c0_i32_0 = arith.constant 0 : i32
    return %arg0, %c0_i32 : i32, i32
  }
}

module attributes {stable_mosaic.version = 11 : i64} {
  func.func @_attn_fullrow_kernel(%arg0: i32, %arg1: memref<8x96xbf16, #tpu.memory_space<vmem>>, %arg2: memref<1x1x8xf32, #tpu.memory_space<vmem>>, %arg3: memref<8x32xbf16, #tpu.memory_space<vmem>>) attributes {dimension_semantics = [#tpu.dimension_semantics<parallel>], iteration_bounds = array<i64: 2>, scalar_prefetch = 0 : i64, scratch_operands = 0 : i64, tpu.core_type = #tpu.core_type<tc>, window_params = [{transform_indices = @transform_0, window_bounds = array<i64: 8, 96>}, {transform_indices = @transform_1, window_bounds = array<i64: 1, 1, 8>}, {transform_indices = @transform_2, window_bounds = array<i64: 8, 32>}]} {
    %c0 = arith.constant 0 : index
    %c0_0 = arith.constant 0 : index
    %0 = vector.load %arg1[%c0, %c0_0] : memref<8x96xbf16, #tpu.memory_space<vmem>>, vector<8x96xbf16>
    %c0_1 = arith.constant 0 : index
    %c0_2 = arith.constant 0 : index
    %c0_3 = arith.constant 0 : index
    %1 = vector.load %arg2[%c0_1, %c0_2, %c0_3] : memref<1x1x8xf32, #tpu.memory_space<vmem>>, vector<1x1x8xf32>
    %2 = vector.shape_cast %1 : vector<1x1x8xf32> to vector<1x8xf32>
    %3 = vector.extract_strided_slice %0 {offsets = [0, 0], sizes = [8, 8], strides = [1, 1]} : vector<8x96xbf16> to vector<8x8xbf16>
    %4 = vector.extract_strided_slice %0 {offsets = [0, 32], sizes = [8, 8], strides = [1, 1]} : vector<8x96xbf16> to vector<8x8xbf16>
    %5 = vector.extract_strided_slice %0 {offsets = [0, 64], sizes = [8, 8], strides = [1, 1]} : vector<8x96xbf16> to vector<8x8xbf16>
    %cst = arith.constant dense<0.000000e+00> : vector<8x8xf32>
    %6 = tpu.matmul %3, %4, %cst {dimension_numbers = #tpu.dot_dimension_numbers<[1], [1], [0], [0], [0, 0, 1, 0], [], []>} : vector<8x8xbf16>, vector<8x8xbf16>, vector<8x8xf32> -> vector<8x8xf32>
    %cst_4 = arith.constant 0.353553385 : f32
    %7 = vector.broadcast %cst_4 : f32 to vector<8x8xf32>
    %8 = arith.mulf %6, %7 : vector<8x8xf32>
    %9 = vector.broadcast %2 : vector<1x8xf32> to vector<8x8xf32>
    %10 = arith.addf %8, %9 : vector<8x8xf32>
    %cst_5 = arith.constant dense<0xFF800000> : vector<8xf32>
    %11 = vector.multi_reduction <maximumf>, %10, %cst_5 [1] : vector<8x8xf32> to vector<8xf32>
    %12 = vector.shape_cast %11 : vector<8xf32> to vector<8x1xf32>
    %13 = vector.broadcast %12 : vector<8x1xf32> to vector<8x8xf32>
    %14 = arith.subf %10, %13 : vector<8x8xf32>
    %15 = math.exp %14 : vector<8x8xf32>
    %cst_6 = arith.constant dense<0.000000e+00> : vector<8xf32>
    %16 = vector.multi_reduction <add>, %15, %cst_6 [1] : vector<8x8xf32> to vector<8xf32>
    %17 = vector.shape_cast %16 : vector<8xf32> to vector<8x1xf32>
    %18 = tpu.reciprocal %17 {approx = true} : vector<8x1xf32> -> vector<8x1xf32>
    %19 = vector.broadcast %18 : vector<8x1xf32> to vector<8x8xf32>
    %20 = arith.mulf %15, %19 : vector<8x8xf32>
    %21 = arith.truncf %20 : vector<8x8xf32> to vector<8x8xbf16>
    %cst_7 = arith.constant dense<0.000000e+00> : vector<8x8xf32>
    %22 = tpu.matmul %21, %5, %cst_7 {dimension_numbers = #tpu.dot_dimension_numbers<[1], [0], [0], [1], [0, 0, 1, 1], [], []>} : vector<8x8xbf16>, vector<8x8xbf16>, vector<8x8xf32> -> vector<8x8xf32>
    %23 = vector.extract_strided_slice %0 {offsets = [0, 8], sizes = [8, 8], strides = [1, 1]} : vector<8x96xbf16> to vector<8x8xbf16>
    %24 = vector.extract_strided_slice %0 {offsets = [0, 40], sizes = [8, 8], strides = [1, 1]} : vector<8x96xbf16> to vector<8x8xbf16>
    %25 = vector.extract_strided_slice %0 {offsets = [0, 72], sizes = [8, 8], strides = [1, 1]} : vector<8x96xbf16> to vector<8x8xbf16>
    %cst_8 = arith.constant dense<0.000000e+00> : vector<8x8xf32>
    %26 = tpu.matmul %23, %24, %cst_8 {dimension_numbers = #tpu.dot_dimension_numbers<[1], [1], [0], [0], [0, 0, 1, 0], [], []>} : vector<8x8xbf16>, vector<8x8xbf16>, vector<8x8xf32> -> vector<8x8xf32>
    %cst_9 = arith.constant 0.353553385 : f32
    %27 = vector.broadcast %cst_9 : f32 to vector<8x8xf32>
    %28 = arith.mulf %26, %27 : vector<8x8xf32>
    %29 = vector.broadcast %2 : vector<1x8xf32> to vector<8x8xf32>
    %30 = arith.addf %28, %29 : vector<8x8xf32>
    %cst_10 = arith.constant dense<0xFF800000> : vector<8xf32>
    %31 = vector.multi_reduction <maximumf>, %30, %cst_10 [1] : vector<8x8xf32> to vector<8xf32>
    %32 = vector.shape_cast %31 : vector<8xf32> to vector<8x1xf32>
    %33 = vector.broadcast %32 : vector<8x1xf32> to vector<8x8xf32>
    %34 = arith.subf %30, %33 : vector<8x8xf32>
    %35 = math.exp %34 : vector<8x8xf32>
    %cst_11 = arith.constant dense<0.000000e+00> : vector<8xf32>
    %36 = vector.multi_reduction <add>, %35, %cst_11 [1] : vector<8x8xf32> to vector<8xf32>
    %37 = vector.shape_cast %36 : vector<8xf32> to vector<8x1xf32>
    %38 = tpu.reciprocal %37 {approx = true} : vector<8x1xf32> -> vector<8x1xf32>
    %39 = vector.broadcast %38 : vector<8x1xf32> to vector<8x8xf32>
    %40 = arith.mulf %35, %39 : vector<8x8xf32>
    %41 = arith.truncf %40 : vector<8x8xf32> to vector<8x8xbf16>
    %cst_12 = arith.constant dense<0.000000e+00> : vector<8x8xf32>
    %42 = tpu.matmul %41, %25, %cst_12 {dimension_numbers = #tpu.dot_dimension_numbers<[1], [0], [0], [1], [0, 0, 1, 1], [], []>} : vector<8x8xbf16>, vector<8x8xbf16>, vector<8x8xf32> -> vector<8x8xf32>
    %43 = vector.extract_strided_slice %0 {offsets = [0, 16], sizes = [8, 8], strides = [1, 1]} : vector<8x96xbf16> to vector<8x8xbf16>
    %44 = vector.extract_strided_slice %0 {offsets = [0, 48], sizes = [8, 8], strides = [1, 1]} : vector<8x96xbf16> to vector<8x8xbf16>
    %45 = vector.extract_strided_slice %0 {offsets = [0, 80], sizes = [8, 8], strides = [1, 1]} : vector<8x96xbf16> to vector<8x8xbf16>
    %cst_13 = arith.constant dense<0.000000e+00> : vector<8x8xf32>
    %46 = tpu.matmul %43, %44, %cst_13 {dimension_numbers = #tpu.dot_dimension_numbers<[1], [1], [0], [0], [0, 0, 1, 0], [], []>} : vector<8x8xbf16>, vector<8x8xbf16>, vector<8x8xf32> -> vector<8x8xf32>
    %cst_14 = arith.constant 0.353553385 : f32
    %47 = vector.broadcast %cst_14 : f32 to vector<8x8xf32>
    %48 = arith.mulf %46, %47 : vector<8x8xf32>
    %49 = vector.broadcast %2 : vector<1x8xf32> to vector<8x8xf32>
    %50 = arith.addf %48, %49 : vector<8x8xf32>
    %cst_15 = arith.constant dense<0xFF800000> : vector<8xf32>
    %51 = vector.multi_reduction <maximumf>, %50, %cst_15 [1] : vector<8x8xf32> to vector<8xf32>
    %52 = vector.shape_cast %51 : vector<8xf32> to vector<8x1xf32>
    %53 = vector.broadcast %52 : vector<8x1xf32> to vector<8x8xf32>
    %54 = arith.subf %50, %53 : vector<8x8xf32>
    %55 = math.exp %54 : vector<8x8xf32>
    %cst_16 = arith.constant dense<0.000000e+00> : vector<8xf32>
    %56 = vector.multi_reduction <add>, %55, %cst_16 [1] : vector<8x8xf32> to vector<8xf32>
    %57 = vector.shape_cast %56 : vector<8xf32> to vector<8x1xf32>
    %58 = tpu.reciprocal %57 {approx = true} : vector<8x1xf32> -> vector<8x1xf32>
    %59 = vector.broadcast %58 : vector<8x1xf32> to vector<8x8xf32>
    %60 = arith.mulf %55, %59 : vector<8x8xf32>
    %61 = arith.truncf %60 : vector<8x8xf32> to vector<8x8xbf16>
    %cst_17 = arith.constant dense<0.000000e+00> : vector<8x8xf32>
    %62 = tpu.matmul %61, %45, %cst_17 {dimension_numbers = #tpu.dot_dimension_numbers<[1], [0], [0], [1], [0, 0, 1, 1], [], []>} : vector<8x8xbf16>, vector<8x8xbf16>, vector<8x8xf32> -> vector<8x8xf32>
    %63 = vector.extract_strided_slice %0 {offsets = [0, 24], sizes = [8, 8], strides = [1, 1]} : vector<8x96xbf16> to vector<8x8xbf16>
    %64 = vector.extract_strided_slice %0 {offsets = [0, 56], sizes = [8, 8], strides = [1, 1]} : vector<8x96xbf16> to vector<8x8xbf16>
    %65 = vector.extract_strided_slice %0 {offsets = [0, 88], sizes = [8, 8], strides = [1, 1]} : vector<8x96xbf16> to vector<8x8xbf16>
    %cst_18 = arith.constant dense<0.000000e+00> : vector<8x8xf32>
    %66 = tpu.matmul %63, %64, %cst_18 {dimension_numbers = #tpu.dot_dimension_numbers<[1], [1], [0], [0], [0, 0, 1, 0], [], []>} : vector<8x8xbf16>, vector<8x8xbf16>, vector<8x8xf32> -> vector<8x8xf32>
    %cst_19 = arith.constant 0.353553385 : f32
    %67 = vector.broadcast %cst_19 : f32 to vector<8x8xf32>
    %68 = arith.mulf %66, %67 : vector<8x8xf32>
    %69 = vector.broadcast %2 : vector<1x8xf32> to vector<8x8xf32>
    %70 = arith.addf %68, %69 : vector<8x8xf32>
    %cst_20 = arith.constant dense<0xFF800000> : vector<8xf32>
    %71 = vector.multi_reduction <maximumf>, %70, %cst_20 [1] : vector<8x8xf32> to vector<8xf32>
    %72 = vector.shape_cast %71 : vector<8xf32> to vector<8x1xf32>
    %73 = vector.broadcast %72 : vector<8x1xf32> to vector<8x8xf32>
    %74 = arith.subf %70, %73 : vector<8x8xf32>
    %75 = math.exp %74 : vector<8x8xf32>
    %cst_21 = arith.constant dense<0.000000e+00> : vector<8xf32>
    %76 = vector.multi_reduction <add>, %75, %cst_21 [1] : vector<8x8xf32> to vector<8xf32>
    %77 = vector.shape_cast %76 : vector<8xf32> to vector<8x1xf32>
    %78 = tpu.reciprocal %77 {approx = true} : vector<8x1xf32> -> vector<8x1xf32>
    %79 = vector.broadcast %78 : vector<8x1xf32> to vector<8x8xf32>
    %80 = arith.mulf %75, %79 : vector<8x8xf32>
    %81 = arith.truncf %80 : vector<8x8xf32> to vector<8x8xbf16>
    %cst_22 = arith.constant dense<0.000000e+00> : vector<8x8xf32>
    %82 = tpu.matmul %81, %65, %cst_22 {dimension_numbers = #tpu.dot_dimension_numbers<[1], [0], [0], [1], [0, 0, 1, 1], [], []>} : vector<8x8xbf16>, vector<8x8xbf16>, vector<8x8xf32> -> vector<8x8xf32>
    %83 = tpu.concatenate %22, %42, %62, %82 in 1 : vector<8x8xf32>, vector<8x8xf32>, vector<8x8xf32>, vector<8x8xf32> -> vector<8x32xf32>
    %84 = arith.truncf %83 : vector<8x32xf32> to vector<8x32xbf16>
    %c0_23 = arith.constant 0 : index
    %c0_24 = arith.constant 0 : index
    %85 = vector.load %arg3[%c0_23, %c0_24] : memref<8x32xbf16, #tpu.memory_space<vmem>>, vector<8x32xbf16>
    tpu.vector_store %arg3[%c0_23, %c0_24], %84 {strides = array<i32>} : memref<8x32xbf16, #tpu.memory_space<vmem>>, vector<8x32xbf16>,
    return
  }
  func.func @transform_0(%arg0: i32) -> (i32, i32) {
    %c0_i32 = arith.constant 0 : i32
    %c0_i32_0 = arith.constant 0 : i32
    return %arg0, %c0_i32 : i32, i32
  }
  func.func @transform_1(%arg0: i32) -> (i32, i32, i32) {
    %c0_i32 = arith.constant 0 : i32
    %c0_i32_0 = arith.constant 0 : i32
    %c0_i32_1 = arith.constant 0 : i32
    return %arg0, %c0_i32, %c0_i32_0 : i32, i32, i32
  }
  func.func @transform_2(%arg0: i32) -> (i32, i32) {
    %c0_i32 = arith.constant 0 : i32
    %c0_i32_0 = arith.constant 0 : i32
    return %arg0, %c0_i32 : i32, i32
  }
}

module attributes {stable_mosaic.version = 11 : i64} {
  func.func @_linear_res_ln_kernel(%arg0: i32, %arg1: memref<16x32xbf16, #tpu.memory_space<vmem>>, %arg2: memref<32x32xbf16, #tpu.memory_space<vmem>>, %arg3: memref<1x32xf32, #tpu.memory_space<vmem>>, %arg4: memref<16x32xbf16, #tpu.memory_space<vmem>>, %arg5: memref<1x32xf32, #tpu.memory_space<vmem>>, %arg6: memref<1x32xf32, #tpu.memory_space<vmem>>, %arg7: memref<16x32xbf16, #tpu.memory_space<vmem>>) attributes {dimension_semantics = [#tpu.dimension_semantics<parallel>], iteration_bounds = array<i64: 1>, scalar_prefetch = 0 : i64, scratch_operands = 0 : i64, tpu.core_type = #tpu.core_type<tc>, window_params = [{transform_indices = @transform_0, window_bounds = array<i64: 16, 32>}, {pipeline_mode = #tpu.pipeline_mode<synchronous>, transform_indices = @transform_1, window_bounds = array<i64: 32, 32>}, {pipeline_mode = #tpu.pipeline_mode<synchronous>, transform_indices = @transform_2, window_bounds = array<i64: 1, 32>}, {transform_indices = @transform_3, window_bounds = array<i64: 16, 32>}, {pipeline_mode = #tpu.pipeline_mode<synchronous>, transform_indices = @transform_4, window_bounds = array<i64: 1, 32>}, {pipeline_mode = #tpu.pipeline_mode<synchronous>, transform_indices = @transform_5, window_bounds = array<i64: 1, 32>}, {transform_indices = @transform_6, window_bounds = array<i64: 16, 32>}]} {
    %c0 = arith.constant 0 : index
    %c0_0 = arith.constant 0 : index
    %0 = vector.load %arg1[%c0, %c0_0] : memref<16x32xbf16, #tpu.memory_space<vmem>>, vector<16x32xbf16>
    %c0_1 = arith.constant 0 : index
    %c0_2 = arith.constant 0 : index
    %1 = vector.load %arg2[%c0_1, %c0_2] : memref<32x32xbf16, #tpu.memory_space<vmem>>, vector<32x32xbf16>
    %cst = arith.constant dense<0.000000e+00> : vector<16x32xf32>
    %2 = tpu.matmul %0, %1, %cst {dimension_numbers = #tpu.dot_dimension_numbers<[1], [0], [0], [1], [0, 0, 1, 1], [], []>} : vector<16x32xbf16>, vector<32x32xbf16>, vector<16x32xf32> -> vector<16x32xf32>
    %c0_3 = arith.constant 0 : index
    %c0_4 = arith.constant 0 : index
    %3 = vector.load %arg3[%c0_3, %c0_4] : memref<1x32xf32, #tpu.memory_space<vmem>>, vector<1x32xf32>
    %4 = vector.broadcast %3 : vector<1x32xf32> to vector<16x32xf32>
    %5 = arith.addf %2, %4 : vector<16x32xf32>
    %c0_5 = arith.constant 0 : index
    %c0_6 = arith.constant 0 : index
    %6 = vector.load %arg4[%c0_5, %c0_6] : memref<16x32xbf16, #tpu.memory_space<vmem>>, vector<16x32xbf16>
    %7 = arith.extf %6 : vector<16x32xbf16> to vector<16x32xf32>
    %8 = arith.addf %5, %7 : vector<16x32xf32>
    %cst_7 = arith.constant dense<0.000000e+00> : vector<16xf32>
    %9 = vector.multi_reduction <add>, %8, %cst_7 [1] : vector<16x32xf32> to vector<16xf32>
    %10 = vector.shape_cast %9 : vector<16xf32> to vector<16x1xf32>
    %cst_8 = arith.constant 3.200000e+01 : f32
    %11 = vector.broadcast %cst_8 : f32 to vector<16x1xf32>
    %12 = arith.divf %10, %11 : vector<16x1xf32>
    %13 = vector.broadcast %12 : vector<16x1xf32> to vector<16x32xf32>
    %14 = arith.subf %8, %13 : vector<16x32xf32>
    %15 = arith.mulf %14, %14 : vector<16x32xf32>
    %cst_9 = arith.constant dense<0.000000e+00> : vector<16xf32>
    %16 = vector.multi_reduction <add>, %15, %cst_9 [1] : vector<16x32xf32> to vector<16xf32>
    %17 = vector.shape_cast %16 : vector<16xf32> to vector<16x1xf32>
    %cst_10 = arith.constant 3.200000e+01 : f32
    %18 = vector.broadcast %cst_10 : f32 to vector<16x1xf32>
    %19 = arith.divf %17, %18 : vector<16x1xf32>
    %20 = vector.broadcast %12 : vector<16x1xf32> to vector<16x32xf32>
    %21 = arith.subf %8, %20 : vector<16x32xf32>
    %cst_11 = arith.constant 9.99999996E-13 : f32
    %22 = vector.broadcast %cst_11 : f32 to vector<16x1xf32>
    %23 = arith.addf %19, %22 : vector<16x1xf32>
    %24 = math.rsqrt %23 : vector<16x1xf32>
    %25 = vector.broadcast %24 : vector<16x1xf32> to vector<16x32xf32>
    %26 = arith.mulf %21, %25 : vector<16x32xf32>
    %c0_12 = arith.constant 0 : index
    %c0_13 = arith.constant 0 : index
    %27 = vector.load %arg5[%c0_12, %c0_13] : memref<1x32xf32, #tpu.memory_space<vmem>>, vector<1x32xf32>
    %28 = vector.broadcast %27 : vector<1x32xf32> to vector<16x32xf32>
    %29 = arith.mulf %26, %28 : vector<16x32xf32>
    %c0_14 = arith.constant 0 : index
    %c0_15 = arith.constant 0 : index
    %30 = vector.load %arg6[%c0_14, %c0_15] : memref<1x32xf32, #tpu.memory_space<vmem>>, vector<1x32xf32>
    %31 = vector.broadcast %30 : vector<1x32xf32> to vector<16x32xf32>
    %32 = arith.addf %29, %31 : vector<16x32xf32>
    %33 = arith.truncf %32 : vector<16x32xf32> to vector<16x32xbf16>
    %c0_16 = arith.constant 0 : index
    %c0_17 = arith.constant 0 : index
    %34 = vector.load %arg7[%c0_16, %c0_17] : memref<16x32xbf16, #tpu.memory_space<vmem>>, vector<16x32xbf16>
    tpu.vector_store %arg7[%c0_16, %c0_17], %33 {strides = array<i32>} : memref<16x32xbf16, #tpu.memory_space<vmem>>, vector<16x32xbf16>,
    return
  }
  func.func @transform_0(%arg0: i32) -> (i32, i32) {
    %c0_i32 = arith.constant 0 : i32
    %c0_i32_0 = arith.constant 0 : i32
    return %arg0, %c0_i32 : i32, i32
  }
  func.func @transform_1(%arg0: i32) -> (i32, i32) {
    %c0_i32 = arith.constant 0 : i32
    %c0_i32_0 = arith.constant 0 : i32
    %c0_i32_1 = arith.constant 0 : i32
    return %c0_i32, %c0_i32_0 : i32, i32
  }
  func.func @transform_2(%arg0: i32) -> (i32, i32) {
    %c0_i32 = arith.constant 0 : i32
    %c0_i32_0 = arith.constant 0 : i32
    %c0_i32_1 = arith.constant 0 : i32
    return %c0_i32, %c0_i32_0 : i32, i32
  }
  func.func @transform_3(%arg0: i32) -> (i32, i32) {
    %c0_i32 = arith.constant 0 : i32
    %c0_i32_0 = arith.constant 0 : i32
    return %arg0, %c0_i32 : i32, i32
  }
  func.func @transform_4(%arg0: i32) -> (i32, i32) {
    %c0_i32 = arith.constant 0 : i32
    %c0_i32_0 = arith.constant 0 : i32
    %c0_i32_1 = arith.constant 0 : i32
    return %c0_i32, %c0_i32_0 : i32, i32
  }
  func.func @transform_5(%arg0: i32) -> (i32, i32) {
    %c0_i32 = arith.constant 0 : i32
    %c0_i32_0 = arith.constant 0 : i32
    %c0_i32_1 = arith.constant 0 : i32
    return %c0_i32, %c0_i32_0 : i32, i32
  }
  func.func @transform_6(%arg0: i32) -> (i32, i32) {
    %c0_i32 = arith.constant 0 : i32
    %c0_i32_0 = arith.constant 0 : i32
    return %arg0, %c0_i32 : i32, i32
  }
}

module attributes {stable_mosaic.version = 11 : i64} {
  func.func @_linear_res_ln_kernel(%arg0: i32, %arg1: memref<16x64xbf16, #tpu.memory_space<vmem>>, %arg2: memref<64x32xbf16, #tpu.memory_space<vmem>>, %arg3: memref<1x32xf32, #tpu.memory_space<vmem>>, %arg4: memref<16x32xbf16, #tpu.memory_space<vmem>>, %arg5: memref<1x32xf32, #tpu.memory_space<vmem>>, %arg6: memref<1x32xf32, #tpu.memory_space<vmem>>, %arg7: memref<16x32xbf16, #tpu.memory_space<vmem>>) attributes {dimension_semantics = [#tpu.dimension_semantics<parallel>], iteration_bounds = array<i64: 1>, scalar_prefetch = 0 : i64, scratch_operands = 0 : i64, tpu.core_type = #tpu.core_type<tc>, window_params = [{transform_indices = @transform_0, window_bounds = array<i64: 16, 64>}, {pipeline_mode = #tpu.pipeline_mode<synchronous>, transform_indices = @transform_1, window_bounds = array<i64: 64, 32>}, {pipeline_mode = #tpu.pipeline_mode<synchronous>, transform_indices = @transform_2, window_bounds = array<i64: 1, 32>}, {transform_indices = @transform_3, window_bounds = array<i64: 16, 32>}, {pipeline_mode = #tpu.pipeline_mode<synchronous>, transform_indices = @transform_4, window_bounds = array<i64: 1, 32>}, {pipeline_mode = #tpu.pipeline_mode<synchronous>, transform_indices = @transform_5, window_bounds = array<i64: 1, 32>}, {transform_indices = @transform_6, window_bounds = array<i64: 16, 32>}]} {
    %c0 = arith.constant 0 : index
    %c0_0 = arith.constant 0 : index
    %0 = vector.load %arg1[%c0, %c0_0] : memref<16x64xbf16, #tpu.memory_space<vmem>>, vector<16x64xbf16>
    %c0_1 = arith.constant 0 : index
    %c0_2 = arith.constant 0 : index
    %1 = vector.load %arg2[%c0_1, %c0_2] : memref<64x32xbf16, #tpu.memory_space<vmem>>, vector<64x32xbf16>
    %cst = arith.constant dense<0.000000e+00> : vector<16x32xf32>
    %2 = tpu.matmul %0, %1, %cst {dimension_numbers = #tpu.dot_dimension_numbers<[1], [0], [0], [1], [0, 0, 1, 1], [], []>} : vector<16x64xbf16>, vector<64x32xbf16>, vector<16x32xf32> -> vector<16x32xf32>
    %c0_3 = arith.constant 0 : index
    %c0_4 = arith.constant 0 : index
    %3 = vector.load %arg3[%c0_3, %c0_4] : memref<1x32xf32, #tpu.memory_space<vmem>>, vector<1x32xf32>
    %4 = vector.broadcast %3 : vector<1x32xf32> to vector<16x32xf32>
    %5 = arith.addf %2, %4 : vector<16x32xf32>
    %c0_5 = arith.constant 0 : index
    %c0_6 = arith.constant 0 : index
    %6 = vector.load %arg4[%c0_5, %c0_6] : memref<16x32xbf16, #tpu.memory_space<vmem>>, vector<16x32xbf16>
    %7 = arith.extf %6 : vector<16x32xbf16> to vector<16x32xf32>
    %8 = arith.addf %5, %7 : vector<16x32xf32>
    %cst_7 = arith.constant dense<0.000000e+00> : vector<16xf32>
    %9 = vector.multi_reduction <add>, %8, %cst_7 [1] : vector<16x32xf32> to vector<16xf32>
    %10 = vector.shape_cast %9 : vector<16xf32> to vector<16x1xf32>
    %cst_8 = arith.constant 3.200000e+01 : f32
    %11 = vector.broadcast %cst_8 : f32 to vector<16x1xf32>
    %12 = arith.divf %10, %11 : vector<16x1xf32>
    %13 = vector.broadcast %12 : vector<16x1xf32> to vector<16x32xf32>
    %14 = arith.subf %8, %13 : vector<16x32xf32>
    %15 = arith.mulf %14, %14 : vector<16x32xf32>
    %cst_9 = arith.constant dense<0.000000e+00> : vector<16xf32>
    %16 = vector.multi_reduction <add>, %15, %cst_9 [1] : vector<16x32xf32> to vector<16xf32>
    %17 = vector.shape_cast %16 : vector<16xf32> to vector<16x1xf32>
    %cst_10 = arith.constant 3.200000e+01 : f32
    %18 = vector.broadcast %cst_10 : f32 to vector<16x1xf32>
    %19 = arith.divf %17, %18 : vector<16x1xf32>
    %20 = vector.broadcast %12 : vector<16x1xf32> to vector<16x32xf32>
    %21 = arith.subf %8, %20 : vector<16x32xf32>
    %cst_11 = arith.constant 9.99999996E-13 : f32
    %22 = vector.broadcast %cst_11 : f32 to vector<16x1xf32>
    %23 = arith.addf %19, %22 : vector<16x1xf32>
    %24 = math.rsqrt %23 : vector<16x1xf32>
    %25 = vector.broadcast %24 : vector<16x1xf32> to vector<16x32xf32>
    %26 = arith.mulf %21, %25 : vector<16x32xf32>
    %c0_12 = arith.constant 0 : index
    %c0_13 = arith.constant 0 : index
    %27 = vector.load %arg5[%c0_12, %c0_13] : memref<1x32xf32, #tpu.memory_space<vmem>>, vector<1x32xf32>
    %28 = vector.broadcast %27 : vector<1x32xf32> to vector<16x32xf32>
    %29 = arith.mulf %26, %28 : vector<16x32xf32>
    %c0_14 = arith.constant 0 : index
    %c0_15 = arith.constant 0 : index
    %30 = vector.load %arg6[%c0_14, %c0_15] : memref<1x32xf32, #tpu.memory_space<vmem>>, vector<1x32xf32>
    %31 = vector.broadcast %30 : vector<1x32xf32> to vector<16x32xf32>
    %32 = arith.addf %29, %31 : vector<16x32xf32>
    %33 = arith.truncf %32 : vector<16x32xf32> to vector<16x32xbf16>
    %c0_16 = arith.constant 0 : index
    %c0_17 = arith.constant 0 : index
    %34 = vector.load %arg7[%c0_16, %c0_17] : memref<16x32xbf16, #tpu.memory_space<vmem>>, vector<16x32xbf16>
    tpu.vector_store %arg7[%c0_16, %c0_17], %33 {strides = array<i32>} : memref<16x32xbf16, #tpu.memory_space<vmem>>, vector<16x32xbf16>,
    return
  }
  func.func @transform_0(%arg0: i32) -> (i32, i32) {
    %c0_i32 = arith.constant 0 : i32
    %c0_i32_0 = arith.constant 0 : i32
    return %arg0, %c0_i32 : i32, i32
  }
  func.func @transform_1(%arg0: i32) -> (i32, i32) {
    %c0_i32 = arith.constant 0 : i32
    %c0_i32_0 = arith.constant 0 : i32
    %c0_i32_1 = arith.constant 0 : i32
    return %c0_i32, %c0_i32_0 : i32, i32
  }
  func.func @transform_2(%arg0: i32) -> (i32, i32) {
    %c0_i32 = arith.constant 0 : i32
    %c0_i32_0 = arith.constant 0 : i32
    %c0_i32_1 = arith.constant 0 : i32
    return %c0_i32, %c0_i32_0 : i32, i32
  }
  func.func @transform_3(%arg0: i32) -> (i32, i32) {
    %c0_i32 = arith.constant 0 : i32
    %c0_i32_0 = arith.constant 0 : i32
    return %arg0, %c0_i32 : i32, i32
  }
  func.func @transform_4(%arg0: i32) -> (i32, i32) {
    %c0_i32 = arith.constant 0 : i32
    %c0_i32_0 = arith.constant 0 : i32
    %c0_i32_1 = arith.constant 0 : i32
    return %c0_i32, %c0_i32_0 : i32, i32
  }
  func.func @transform_5(%arg0: i32) -> (i32, i32) {
    %c0_i32 = arith.constant 0 : i32
    %c0_i32_0 = arith.constant 0 : i32
    %c0_i32_1 = arith.constant 0 : i32
    return %c0_i32, %c0_i32_0 : i32, i32
  }
  func.func @transform_6(%arg0: i32) -> (i32, i32) {
    %c0_i32 = arith.constant 0 : i32
    %c0_i32_0 = arith.constant 0 : i32
    return %arg0, %c0_i32 : i32, i32
  }
}

module attributes {stable_mosaic.version = 11 : i64} {
  func.func @_linear_resident_kernel(%arg0: i32, %arg1: memref<16x32xbf16, #tpu.memory_space<vmem>>, %arg2: memref<32x64xbf16, #tpu.memory_space<vmem>>, %arg3: memref<1x64xf32, #tpu.memory_space<vmem>>, %arg4: memref<16x64xbf16, #tpu.memory_space<vmem>>) attributes {dimension_semantics = [#tpu.dimension_semantics<parallel>], iteration_bounds = array<i64: 1>, scalar_prefetch = 0 : i64, scratch_operands = 0 : i64, tpu.core_type = #tpu.core_type<tc>, window_params = [{transform_indices = @transform_0, window_bounds = array<i64: 16, 32>}, {pipeline_mode = #tpu.pipeline_mode<synchronous>, transform_indices = @transform_1, window_bounds = array<i64: 32, 64>}, {pipeline_mode = #tpu.pipeline_mode<synchronous>, transform_indices = @transform_2, window_bounds = array<i64: 1, 64>}, {transform_indices = @transform_3, window_bounds = array<i64: 16, 64>}]} {
    %c0 = arith.constant 0 : index
    %c0_0 = arith.constant 0 : index
    %0 = vector.load %arg1[%c0, %c0_0] : memref<16x32xbf16, #tpu.memory_space<vmem>>, vector<16x32xbf16>
    %c0_1 = arith.constant 0 : index
    %c0_2 = arith.constant 0 : index
    %1 = vector.load %arg2[%c0_1, %c0_2] : memref<32x64xbf16, #tpu.memory_space<vmem>>, vector<32x64xbf16>
    %cst = arith.constant dense<0.000000e+00> : vector<16x64xf32>
    %2 = tpu.matmul %0, %1, %cst {dimension_numbers = #tpu.dot_dimension_numbers<[1], [0], [0], [1], [0, 0, 1, 1], [], []>} : vector<16x32xbf16>, vector<32x64xbf16>, vector<16x64xf32> -> vector<16x64xf32>
    %c0_3 = arith.constant 0 : index
    %c0_4 = arith.constant 0 : index
    %3 = vector.load %arg3[%c0_3, %c0_4] : memref<1x64xf32, #tpu.memory_space<vmem>>, vector<1x64xf32>
    %4 = vector.broadcast %3 : vector<1x64xf32> to vector<16x64xf32>
    %5 = arith.addf %2, %4 : vector<16x64xf32>
    %6 = arith.mulf %5, %5 : vector<16x64xf32>
    %7 = arith.mulf %5, %6 : vector<16x64xf32>
    %cst_5 = arith.constant 4.471500e-02 : f32
    %8 = vector.broadcast %cst_5 : f32 to vector<16x64xf32>
    %9 = arith.mulf %8, %7 : vector<16x64xf32>
    %10 = arith.addf %5, %9 : vector<16x64xf32>
    %cst_6 = arith.constant 0.797884583 : f32
    %11 = vector.broadcast %cst_6 : f32 to vector<16x64xf32>
    %12 = arith.mulf %11, %10 : vector<16x64xf32>
    %13 = math.tanh %12 : vector<16x64xf32>
    %cst_7 = arith.constant 1.000000e+00 : f32
    %14 = vector.broadcast %cst_7 : f32 to vector<16x64xf32>
    %15 = arith.addf %14, %13 : vector<16x64xf32>
    %cst_8 = arith.constant 5.000000e-01 : f32
    %16 = vector.broadcast %cst_8 : f32 to vector<16x64xf32>
    %17 = arith.mulf %16, %15 : vector<16x64xf32>
    %18 = arith.mulf %5, %17 : vector<16x64xf32>
    %19 = arith.truncf %18 : vector<16x64xf32> to vector<16x64xbf16>
    %c0_9 = arith.constant 0 : index
    %c0_10 = arith.constant 0 : index
    %20 = vector.load %arg4[%c0_9, %c0_10] : memref<16x64xbf16, #tpu.memory_space<vmem>>, vector<16x64xbf16>
    tpu.vector_store %arg4[%c0_9, %c0_10], %19 {strides = array<i32>} : memref<16x64xbf16, #tpu.memory_space<vmem>>, vector<16x64xbf16>,
    return
  }
  func.func @transform_0(%arg0: i32) -> (i32, i32) {
    %c0_i32 = arith.constant 0 : i32
    %c0_i32_0 = arith.constant 0 : i32
    return %arg0, %c0_i32 : i32, i32
  }
  func.func @transform_1(%arg0: i32) -> (i32, i32) {
    %c0_i32 = arith.constant 0 : i32
    %c0_i32_0 = arith.constant 0 : i32
    %c0_i32_1 = arith.constant 0 : i32
    return %c0_i32, %c0_i32_0 : i32, i32
  }
  func.func @transform_2(%arg0: i32) -> (i32, i32) {
    %c0_i32 = arith.constant 0 : i32
    %c0_i32_0 = arith.constant 0 : i32
    %c0_i32_1 = arith.constant 0 : i32
    return %c0_i32, %c0_i32_0 : i32, i32
  }
  func.func @transform_3(%arg0: i32) -> (i32, i32) {
    %c0_i32 = arith.constant 0 : i32
    %c0_i32_0 = arith.constant 0 : i32
    return %arg0, %c0_i32 : i32, i32
  }
}

</mosaic_0001>

<bundles_post_ra>
// kernel: finetune_probe_forward.11
= control target key start
LH: loop header
LB: loop body
LE: loop exit
PB: predicated region body
PF: predicated region fallthrough
CT: control target
= control target key end

     0   :  { %vm16_vm0 = vcmask 261120   ;;  %vm70_vm1 = vcmask 257024   ;;  %s129_s0 = inlined_call_operand.vmem [shape: f32[16,32], index: 0, kind: input, shape index: {}]   ;;  %s130_s1 = inlined_call_operand.vmem [shape: f32[1,32], index: 1, kind: input, shape index: {}]   ;;  %s131_s2 = inlined_call_operand.vmem [shape: f32[1,32], index: 2, kind: input, shape index: {}]   ;;  %s132_s3 = inlined_call_operand.vmem [shape: bf16[16,32], index: 3, kind: output, shape index: {}]  }
   0x1   :  { %v14_v0 = vld [vmem:[%s129_s0] sm:$0xff]  ;;  %v15_v1 = vld [vmem:[%s129_s0 + $0x8] sm:$0xff] }
   0x2   :  { %v17_v2 = vsel %vm16_vm0, %v14_v0, 0.0  ;;  %v20_v3 = vsel %vm16_vm0, %v15_v1, 0.0  ;;  %v77_v21 = vld [vmem:[%s130_s1] ss:$0 sm:$0xff] }
   0x3   :  { %18 = vadd.xlane.f32.xlu0 %v17_v2  ;;  %v78_v23 = vld [vmem:[%s131_s2] ss:$0 sm:$0xff] }
   0x7   :  { %21 = vadd.xlane.f32.xlu0 %v20_v3 }
  0x90   :  { %v19_v4 = vpop.xlane.xlu0 %18 }
  0x91   :  { %v24_v5 = vmul.f32 0.03125, %v19_v4 }
  0x93   :  { %v26_v6 = vsub.f32 %v14_v0, %v24_v5 }
  0x94   :  { %v22_v7 = vpop.xlane.xlu0 %21 }
  0x95   :  { %v25_v8 = vmul.f32 0.03125, %v22_v7  ;;  %v28_v9 = vmul.f32 %v26_v6, %v26_v6 }
  0x97   :  { %v27_v10 = vsub.f32 %v15_v1, %v25_v8  ;;  %v30_v11 = vsel %vm16_vm0, %v28_v9, 0.0 }
  0x98   :  { %31 = vadd.xlane.f32.xlu1 %v30_v11 }
  0x99   :  { %v29_v12 = vmul.f32 %v27_v10, %v27_v10 }
  0x9b   :  { %v33_v13 = vsel %vm16_vm0, %v29_v12, 0.0 }
  0x9c   :  { %34 = vadd.xlane.f32.xlu1 %v33_v13 }
 0x125   :  { %v32_v14 = vpop.xlane.xlu1 %31 }
 0x126   :  { %v36_v15 = vmul.f32 0.03125, %v32_v14 }
 0x128   :  { %v38_v16 = vadd.f32 1e-12, %v36_v15 }
 0x129   :  { %v35_v17 = vpop.xlane.xlu1 %34 }
 0x12a   :  { %83 = vrsqrt.f32 %v38_v16  ;;  %v37_v18 = vmul.f32 0.03125, %v35_v17 }
 0x12c   :  { %v39_v19 = vadd.f32 1e-12, %v37_v18 }
 0x12e   :  { %85 = vrsqrt.f32 %v39_v19 }
 0x134   :  { %v84_v20 = vpop.eup %83 }
 0x135   :  { %v42_v22 = vmul.f32 %v84_v20, %v26_v6 }
 0x137   :  { %v51_v24 = vmul.f32 %v77_v21, %v42_v22 }
 0x138   :  { %v86_v25 = vpop.eup %85 }
 0x139   :  { %v60_v26 = vadd.f32 %v78_v23, %v51_v24  ;;  %v43_v27 = vmul.f32 %v86_v25, %v27_v10 }
 0x13b   :  { %v81_v28 = vpack.c.bf16 %v60_v26, %v60_v26  ;;  %v52_v29 = vmul.f32 %v77_v21, %v43_v27 }
 0x13d   :  { %71 = vst.msk [vmem:[%s132_s3] sm:$0xf] %vm70_vm1, %v81_v28  ;;  %v61_v30 = vadd.f32 %v78_v23, %v52_v29 }
 0x13f   :  { %v82_v31 = vpack.c.bf16 %v61_v30, %v61_v30 }
 0x141   :  { %72 = vst.msk [vmem:[%s132_s3 + $0x4] sm:$0xf] %vm70_vm1, %v82_v31 }

// kernel: finetune_probe_forward.12
= control target key start
LH: loop header
LB: loop body
LE: loop exit
PB: predicated region body
PF: predicated region fallthrough
CT: control target
= control target key end

     0   :  { %v130_v0 = vmov 0.0   ;;  %vm131_vm0 = vmmov 0   ;;  %vm45_vm1 = vcmask 261120   ;;  %vm98_vm2 = vcmask 781312   ;;  %s170_s1 = inlined_call_operand.vmem [shape: bf16[32,96], index: 1, kind: input, shape index: {}]   ;;  %s171_s0 = inlined_call_operand.vmem [shape: bf16[16,32], index: 0, kind: input, shape index: {}]   ;;  %s172_s2 = inlined_call_operand.vmem [shape: f32[1,96], index: 2, kind: input, shape index: {}]   ;;  %s173_s3 = inlined_call_operand.vmem [shape: bf16[16,96], index: 3, kind: output, shape index: {}]  }
   0x1   :  { %117 = vmatprep.subr.bf16.mxu0 %v130_v0  ;;  %v127_v1 = vld [vmem:[%s170_s1] sm:$0xff]   ;;  %121 = vmatprep.mubr.msk.bf16.mxu0 %vm131_vm0, %v130_v0  ;;  %v128_v2 = vld [vmem:[%s170_s1 + $0x8] sm:$0xff]  }
   0x2   :  { %118 = vmatpush3.bf16.msra.mxu0 %v127_v1  ;;  %v129_v3 = vld [vmem:[%s171_s0] sm:$0xff]  }
   0x3   :  { %119 = vmatprep.subr.bf16.mxu0 %v130_v0  ;;  %v105_v4 = vld [vmem:[%s172_s2] ss:$0 sm:$0xff] }
   0x6   :  { %120 = vmatpush3.bf16.msra.mxu0 %v128_v2 }
   0x9   :  { %122 = vmatmul.mubr.msk.bf16.vlgmr.msra.gmra.mrb[0].mxu0 %vm45_vm1, %v129_v3 }
  0xdc   :  { %v83_v5 = vpop.f32.mrb[0].mxu0 }
  0xdd   :  { %v84_v6 = vadd.f32 %v105_v4, %v83_v5  ;;  %v123_v7 = vpop.f32.mrb[1].mxu0 }
  0xde   :  { %v86_v8 = vpop.f32.mrb[2].mxu0 }
  0xdf   :  { %v112_v9 = vpack.c.bf16 %v84_v6, %v84_v6  ;;  %v87_v10 = vadd.f32 %v105_v4, %v86_v8  ;;  %v124_v11 = vpop.f32.mrb[3].mxu0 }
  0xe1   :  { %99 = vst.msk [vmem:[%s173_s3] sm:$0xf] %vm98_vm2, %v112_v9  ;;  %v113_v12 = vpack.c.bf16 %v87_v10, %v87_v10 }
  0xe3   :  { %100 = vst.msk [vmem:[%s173_s3 + $0x4] sm:$0xf] %vm98_vm2, %v113_v12 }

// kernel: finetune_probe_forward.14
= control target key start
LH: loop header
LB: loop body
LE: loop exit
PB: predicated region body
PF: predicated region fallthrough
CT: control target
= control target key end

     0   :  { %v200_v0 = vmov 0.0   ;;  %vm201_vm0 = vmmov 0   ;;  %vm54_vm1 = vcmask 261120   ;;  %vm158_vm2 = vcmask 257024   ;;  %s269_s1 = inlined_call_operand.vmem [shape: bf16[32,32], index: 1, kind: input, shape index: {}]   ;;  %s270_s0 = inlined_call_operand.vmem [shape: bf16[16,32], index: 0, kind: input, shape index: {}]   ;;  %s271_s3 = inlined_call_operand.vmem [shape: bf16[16,32], index: 3, kind: input, shape index: {}]   ;;  %s272_s2 = inlined_call_operand.vmem [shape: f32[1,32], index: 2, kind: input, shape index: {}]   ;;  %s273_s4 = inlined_call_operand.vmem [shape: f32[1,32], index: 4, kind: input, shape index: {}]   ;;  %s274_s5 = inlined_call_operand.vmem [shape: f32[1,32], index: 5, kind: input, shape index: {}]   ;;  %s275_s6 = inlined_call_operand.vmem [shape: bf16[16,32], index: 6, kind: output, shape index: {}]  }
   0x1   :  { %183 = vmatprep.subr.bf16.mxu0 %v200_v0  ;;  %v193_v1 = vld [vmem:[%s269_s1] sm:$0xff]   ;;  %187 = vmatprep.mubr.msk.bf16.mxu0 %vm201_vm0, %v200_v0  ;;  %v194_v2 = vld [vmem:[%s269_s1 + $0x8] sm:$0xff]  }
   0x2   :  { %184 = vmatpush3.bf16.msra.mxu0 %v193_v1  ;;  %v195_v3 = vld [vmem:[%s270_s0] sm:$0xff]  }
   0x3   :  { %185 = vmatprep.subr.bf16.mxu0 %v200_v0  ;;  %v177_v4 = vld [vmem:[%s271_s3] sm:$0xff]  }
   0x4   :  { %v165_v5 = vld [vmem:[%s272_s2] ss:$0 sm:$0xff]  ;;  %v178_v6 = vunpack.c.l.bf16 %v177_v4  ;;  %v179_v10 = vunpack.c.h.bf16 %v177_v4 }
   0x5   :  { %v170_v35 = vld [vmem:[%s273_s4] ss:$0 sm:$0xff] }
   0x6   :  { %186 = vmatpush3.bf16.msra.mxu0 %v194_v2  ;;  %v171_v37 = vld [vmem:[%s274_s5] ss:$0 sm:$0xff] }
   0x9   :  { %188 = vmatmul.mubr.msk.bf16.vlgmr.msra.gmra.mrb[0].mxu0 %vm54_vm1, %v195_v3 }
  0xdc   :  { %v92_v7 = vpop.f32.mrb[0].mxu0 }
  0xdd   :  { %v93_v8 = vadd.f32 %v165_v5, %v92_v7  ;;  %v189_v9 = vpop.f32.mrb[1].mxu0 }
  0xde   :  { %v95_v11 = vpop.f32.mrb[2].mxu0 }
  0xdf   :  { %v96_v12 = vadd.f32 %v165_v5, %v95_v11  ;;  %v190_v13 = vpop.f32.mrb[3].mxu0  ;;  %v103_v14 = vadd.f32 %v178_v6, %v93_v8 }
  0xe1   :  { %v105_v15 = vsel %vm54_vm1, %v103_v14, 0.0  ;;  %v104_v16 = vadd.f32 %v179_v10, %v96_v12 }
  0xe2   :  { %106 = vadd.xlane.f32.xlu0 %v105_v15 }
  0xe3   :  { %v108_v17 = vsel %vm54_vm1, %v104_v16, 0.0 }
  0xe6   :  { %109 = vadd.xlane.f32.xlu0 %v108_v17 }
 0x16f   :  { %v107_v18 = vpop.xlane.xlu0 %106 }
 0x170   :  { %v112_v19 = vmul.f32 0.03125, %v107_v18 }
 0x172   :  { %v114_v20 = vsub.f32 %v103_v14, %v112_v19 }
 0x173   :  { %v110_v21 = vpop.xlane.xlu0 %109 }
 0x174   :  { %v113_v22 = vmul.f32 0.03125, %v110_v21  ;;  %v116_v23 = vmul.f32 %v114_v20, %v114_v20 }
 0x176   :  { %v115_v24 = vsub.f32 %v104_v16, %v113_v22  ;;  %v118_v25 = vsel %vm54_vm1, %v116_v23, 0.0 }
 0x177   :  { %119 = vadd.xlane.f32.xlu1 %v118_v25 }
 0x178   :  { %v117_v26 = vmul.f32 %v115_v24, %v115_v24 }
 0x17a   :  { %v121_v27 = vsel %vm54_vm1, %v117_v26, 0.0 }
 0x17b   :  { %122 = vadd.xlane.f32.xlu1 %v121_v27 }
 0x204   :  { %v120_v28 = vpop.xlane.xlu1 %119 }
 0x205   :  { %v124_v29 = vmul.f32 0.03125, %v120_v28 }
 0x207   :  { %v126_v30 = vadd.f32 1e-12, %v124_v29 }
 0x208   :  { %v123_v31 = vpop.xlane.xlu1 %122 }
 0x209   :  { %196 = vrsqrt.f32 %v126_v30  ;;  %v125_v32 = vmul.f32 0.03125, %v123_v31 }
 0x20b   :  { %v127_v33 = vadd.f32 1e-12, %v125_v32 }
 0x20d   :  { %198 = vrsqrt.f32 %v127_v33 }
 0x213   :  { %v197_v34 = vpop.eup %196 }
 0x214   :  { %v130_v36 = vmul.f32 %v197_v34, %v114_v20 }
 0x216   :  { %v139_v38 = vmul.f32 %v170_v35, %v130_v36 }
 0x217   :  { %v199_v39 = vpop.eup %198 }
 0x218   :  { %v148_v40 = vadd.f32 %v171_v37, %v139_v38  ;;  %v131_v41 = vmul.f32 %v199_v39, %v115_v24 }
 0x21a   :  { %v174_v42 = vpack.c.bf16 %v148_v40, %v148_v40  ;;  %v140_v43 = vmul.f32 %v170_v35, %v131_v41 }
 0x21c   :  { %159 = vst.msk [vmem:[%s275_s6] sm:$0xf] %vm158_vm2, %v174_v42  ;;  %v149_v44 = vadd.f32 %v171_v37, %v140_v43 }
 0x21e   :  { %v175_v45 = vpack.c.bf16 %v149_v44, %v149_v44 }
 0x220   :  { %160 = vst.msk [vmem:[%s275_s6 + $0x4] sm:$0xf] %vm158_vm2, %v175_v45 }

// kernel: finetune_probe_forward.13
= control target key start
LH: loop header
LB: loop body
LE: loop exit
PB: predicated region body
PF: predicated region fallthrough
CT: control target
= control target key end

     0   :  { %s858_s9 = smov 0   ;;  %s957_s0 = inlined_call_operand.vmem [shape: bf16[16,96], index: 0, kind: input, shape index: {}]   ;;  %s958_s1 = inlined_call_operand.vmem [shape: f32[2,1,8], index: 1, kind: input, shape index: {}]   ;;  %s959_s2 = inlined_call_operand.vmem [shape: bf16[16,32], index: 2, kind: output, shape index: {}]  }
   0x1 LB: > { %s695_s10 = sadd.s32 4294967295, %s825_s9   ;;  %p699_p0 = scmp.ge.s32.totalorder %s825_s9, 1  ;;  %s825_s9 = sphi %s858_s9, %s12_s9  }
   0x2   : > { %p119_p1 = scmp.lt.s32.totalorder %s825_s9, 3 }
   0x4   : > { %p120_p2 = pnand %p699_p0, %p119_p1 }
   0x5   : > { %p142_p3 = scmp.lt.s32.totalorder (!%p120_p2), %s695_s10, 1  ;;  %v827_v0 = vmov (!%p120_p2), 0.0   ;;  %vm828_vm0 = vmmov (!%p120_p2), 0   ;;  %s829_s15 = smov (!%p120_p2), 96   ;;  %vm161_vm1 = vcmask (!%p120_p2), 64512   ;;  %vm233_vm2 = vcmask (!%p120_p2), 1043456  }
   0x6   : > { %123 = sbr.rel (%p120_p2) target bundleno = 1606 (0x646), region = 28  ;;  %730 = vmatprep.subr.bf16.mxu0 (!%p120_p2), %v827_v0  ;;  %732 = vmatprep.mubr.msk.bf16.mxu0 (!%p120_p2), %vm828_vm0, %v827_v0  ;;  %s830_s16 = smov (!%p120_p2), 64   ;;  %vm626_vm3 = vcmask (!%p120_p2), 130048   ;;  %vm628_vm4 = vcmask (!%p120_p2), 195584   ;;  %vm631_vm5 = vcmask (!%p120_p2), 257024  }
   0x7   : > { %736 = vmatprep.subr.bf16.mxu1 (!%p120_p2), %v827_v0  ;;  %738 = vmatprep.mubr.msk.bf16.mxu1 (!%p120_p2), %vm828_vm0, %v827_v0  ;;  %s831_s17 = smov (!%p120_p2), 88   ;;  %s832_s21 = smov (!%p120_p2), 72  }
   0x8   : > { %s833_s22 = smov (!%p120_p2), 120   ;;  %s834_s23 = smov (!%p120_p2), 80  }
   0x9   : > { %s835_s24 = smov (!%p120_p2), 112   ;;  %s836_s25 = smov (!%p120_p2), 104  }
   0xa   : > { %s837_s26 = smov (!%p120_p2), 56   ;;  %s838_s27 = smov (!%p120_p2), 48  }
   0xb   : > { %s839_s28 = smov (!%p120_p2), 40   ;;  %s840_s29 = smov (!%p120_p2), 8  }
   0xc   : > { %s841_s30 = smov (!%p120_p2), 16   ;;  %s842_s3 = smov (!%p120_p2), 24  }
   0xd   : > { %s961_s10 = smov (!%p142_p3, %s695_s10), 1 }
   0xe   : > { %s700_s11 = sshll.u32 %s961_s10, 2  ;;  %s148_s20 = scalar_lea.vmem %s958_s1, %s961_s10 }
   0xf   : > { %s145_s14 = scalar_lea.vmem %s957_s0, %s700_s11  ;;  %v894_v6 = vld [vmem:[%s148_s20] ss:$0 sm:$0xff]  ;;  %s152_s6 = scalar_lea.vmem %s959_s2, %s700_s11 }
  0x10   : > { %v154_v1 = vld [vmem:[%s145_s14] sm:$0xf] }
  0x11   : > { %v880_v2 = vcombine.low %v154_v1, %v154_v1 }
  0x13   : > { %159 = vrot.lane.b32.xlu0 %v880_v2, %s829_s15  ;;  %228 = vrot.lane.b32.xlu1 %v880_v2, %s830_s16 }
  0x17   : > { %279 = vrot.lane.b32.xlu1 %v880_v2, %s831_s17 }
  0x85   : > { %v160_v3 = vpop.permute.xlu0 %159  ;;  %v229_v13 = vpop.permute.xlu1 %228 }
  0x86   : > { %v166_v4 = vsel %vm161_vm1, %v160_v3, 0  ;;  %v235_v14 = vsel %vm233_vm2, %v229_v13, 0 }
  0x87   : > { %731 = vmatpush3.bf16.xpose.msra.mxu0 %v166_v4  ;;  %737 = vmatpush3.bf16.msra.mxu1 %v235_v14 }
  0x88   : > { %748 = vmatprep.subr.bf16.mxu0 %v827_v0  ;;  %742 = vmatprep.subr.bf16.mxu1 %v827_v0 }
  0x89   : > { %v280_v20 = vpop.permute.xlu1 %279 }
  0x8a   : > { %v285_v26 = vsel %vm161_vm1, %v280_v20, 0 }
  0x8e   : > { %733 = vmatmul.mubr.msk.bf16.vlgmr.msra.gmra.mrb[0].mxu0 %vm161_vm1, %v154_v1 }
  0x8f   : > { %750 = vmatprep.mubr.msk.bf16.mxu0 %vm828_vm0, %v827_v0 }
 0x161   : > { %v202_v5 = vpop.f32.mrb[0].mxu0 }
 0x162   : > { %v208_v7 = vmul.f32 0.35355338, %v202_v5  ;;  %v734_v8 = vpop.f32.mrb[1].mxu0 }
 0x163   : > { %v205_v9 = vpop.f32.mrb[2].mxu0 }
 0x164   : > { %v735_v10 = vpop.f32.mrb[3].mxu0  ;;  %v215_v11 = vadd.f32 %v894_v6, %v208_v7 }
 0x166   : > { %v216_v12 = vsel %vm161_vm1, %v215_v11, -inf }
 0x167   : > { %217 = vmax.xlane.f32.xlu0 %v216_v12 }
 0x17d   : > { %503 = vrot.lane.b32.xlu0 %v880_v2, %s832_s21 }
 0x1f4   : > { %v218_v15 = vpop.xlane.xlu0 %217 }
 0x1f5   : > { %v219_v16 = vsub.f32 %v215_v11, %v218_v15 }
 0x1f7   : > { %v220_v17 = vmul.f32 1.442695, %v219_v16 }
 0x1f8   : > { %v504_v29 = vpop.permute.xlu0 %503 }
 0x1f9   : > { %803 = vpow2.f32 %v220_v17  ;;  %v509_v31 = vsel %vm161_vm1, %v504_v29, 0 }
 0x203   : > { %v804_v18 = vpop.eup %803 }
 0x204   : > { %v222_v19 = vsel %vm161_vm1, %v804_v18, 0.0 }
 0x205   : > { %223 = vadd.xlane.f32.xlu1 %v222_v19 }
 0x216   : > { %277 = vrot.lane.b32.xlu1 %v880_v2, %s833_s22 }
 0x21a   : > { %391 = vrot.lane.b32.xlu1 %v880_v2, %s834_s23 }
 0x21e   : > { %389 = vrot.lane.b32.xlu1 %v880_v2, %s835_s24 }
 0x222   : > { %501 = vrot.lane.b32.xlu1 %v880_v2, %s836_s25 }
 0x292   : > { %v224_v21 = vpop.xlane.xlu1 %223 }
 0x293   : > { %805 = vrcp.f32 %v224_v21 }
 0x296   : > { %v278_v24 = vpop.permute.xlu1 %277 }
 0x29a   : > { %v392_v27 = vpop.permute.xlu1 %391 }
 0x29b   : > { %v397_v28 = vsel %vm161_vm1, %v392_v27, 0 }
 0x29d   : > { %v806_v22 = vpop.eup %805 }
 0x29e   : > { %v226_v23 = vmul.f32 %v806_v22, %v804_v18  ;;  %v390_v30 = vpop.permute.xlu1 %389 }
 0x2a0   : > { %v227_v25 = vpack.c.bf16 %v226_v23, %v226_v23 }
 0x2a2   : > { %739 = vmatmul.mubr.msk.bf16.vlgmr.msra.gmra.mrb[0].mxu1 %vm161_vm1, %v227_v25  ;;  %v502_v32 = vpop.permute.xlu1 %501 }
 0x2a3   : > { %743 = vmatpush3.bf16.xpose.msra.mxu1 %v285_v26  ;;  %744 = vmatprep.mubr.msk.bf16.mxu1 %vm828_vm0, %v827_v0 }
 0x2a4   : > { %754 = vmatprep.subr.bf16.mxu1 %v827_v0 }
 0x2aa   : > { %745 = vmatmul.mubr.msk.bf16.vlgmr.msra.gmra.mrb[4].mxu1 %vm161_vm1, %v278_v24 }
 0x2ab   : > { %755 = vmatpush3.bf16.xpose.msra.mxu1 %v397_v28  ;;  %756 = vmatprep.mubr.msk.bf16.mxu1 %vm828_vm0, %v827_v0 }
 0x2ac   : > { %766 = vmatprep.subr.bf16.mxu1 %v827_v0 }
 0x2b2   : > { %757 = vmatmul.mubr.msk.bf16.vlgmr.msra.gmra.mrb[8].mxu1 %vm161_vm1, %v390_v30 }
 0x2b3   : > { %767 = vmatpush3.bf16.xpose.msra.mxu1 %v509_v31  ;;  %768 = vmatprep.mubr.msk.bf16.mxu1 %vm828_vm0, %v827_v0 }
 0x2ba   : > { %769 = vmatmul.mubr.msk.bf16.vlgmr.msra.gmra.mrb[12].mxu1 %vm161_vm1, %v502_v32 }
 0x375   : > { %v921_v33 = vpop.f32.mrb[0].mxu1 }
 0x376   : > { %v740_v34 = vpop.f32.mrb[1].mxu1 }
 0x377   : > { %v274_v35 = vpop.f32.mrb[2].mxu1 }
 0x378   : > { %v741_v36 = vpop.f32.mrb[3].mxu1 }
 0x37d   : > { %v321_v37 = vpop.f32.mrb[4].mxu1 }
 0x37e   : > { %v327_v38 = vmul.f32 0.35355338, %v321_v37  ;;  %v746_v39 = vpop.f32.mrb[5].mxu1 }
 0x37f   : > { %v324_v40 = vpop.f32.mrb[6].mxu1 }
 0x380   : > { %v747_v41 = vpop.f32.mrb[7].mxu1  ;;  %v328_v42 = vadd.f32 %v894_v6, %v327_v38 }
 0x382   : > { %v329_v43 = vsel %vm161_vm1, %v328_v42, -inf }
 0x383   : > { %330 = vmax.xlane.f32.xlu1 %v329_v43 }
 0x385   : > { %v433_v44 = vpop.f32.mrb[8].mxu1 }
 0x386   : > { %v439_v45 = vmul.f32 0.35355338, %v433_v44  ;;  %v758_v46 = vpop.f32.mrb[9].mxu1 }
 0x387   : > { %v436_v47 = vpop.f32.mrb[10].mxu1 }
 0x388   : > { %v440_v48 = vadd.f32 %v894_v6, %v439_v45  ;;  %v759_v49 = vpop.f32.mrb[11].mxu1 }
 0x38a   : > { %v441_v50 = vsel %vm161_vm1, %v440_v48, -inf }
 0x38b   : > { %442 = vmax.xlane.f32.xlu0 %v441_v50 }
 0x38d   : > { %v545_v51 = vpop.f32.mrb[12].mxu1 }
 0x38e   : > { %v551_v52 = vmul.f32 0.35355338, %v545_v51  ;;  %v770_v53 = vpop.f32.mrb[13].mxu1 }
 0x38f   : > { %v548_v54 = vpop.f32.mrb[14].mxu1 }
 0x390   : > { %v552_v55 = vadd.f32 %v894_v6, %v551_v52  ;;  %v771_v56 = vpop.f32.mrb[15].mxu1 }
 0x392   : > { %v553_v57 = vsel %vm161_vm1, %v552_v55, -inf }
 0x393   : > { %554 = vmax.xlane.f32.xlu1 %v553_v57 }
 0x410   : > { %v331_v58 = vpop.xlane.xlu1 %330 }
 0x411   : > { %v332_v59 = vsub.f32 %v328_v42, %v331_v58 }
 0x413   : > { %v333_v60 = vmul.f32 1.442695, %v332_v59 }
 0x415   : > { %807 = vpow2.f32 %v333_v60 }
 0x418   : > { %v443_v6 = vpop.xlane.xlu0 %442 }
 0x419   : > { %v444_v7 = vsub.f32 %v440_v48, %v443_v6 }
 0x41b   : > { %v445_v8 = vmul.f32 1.442695, %v444_v7 }
 0x41f   : > { %v808_v61 = vpop.eup %807 }
 0x420   : > { %v555_v62 = vpop.xlane.xlu1 %554  ;;  %v335_v63 = vsel %vm161_vm1, %v808_v61, 0.0 }
 0x421   : > { %v556_v1 = vsub.f32 %v552_v55, %v555_v62  ;;  %336 = vadd.xlane.f32.xlu1 %v335_v63 }
 0x423   : > { %v557_v3 = vmul.f32 1.442695, %v556_v1 }
 0x425   : > { %809 = vpow2.f32 %v557_v3 }
 0x426   : > { %811 = vpow2.f32 %v445_v8 }
 0x42f   : > { %v810_v4 = vpop.eup %809 }
 0x430   : > { %v559_v5 = vsel %vm161_vm1, %v810_v4, 0.0  ;;  %v812_v9 = vpop.eup %811 }
 0x431   : > { %560 = vadd.xlane.f32.xlu0 %v559_v5  ;;  %v447_v10 = vsel %vm161_vm1, %v812_v9, 0.0 }
 0x432   : > { %341 = vrot.lane.b32.xlu1 %v880_v2, %s837_s26 }
 0x447   : > { %453 = vrot.lane.b32.xlu0 %v880_v2, %s838_s27 }
 0x456   : > { %448 = vadd.xlane.f32.xlu1 %v447_v10 }
 0x467   : > { %565 = vrot.lane.b32.xlu1 %v880_v2, %s839_s28 }
 0x4ae   : > { %v337_v11 = vpop.xlane.xlu1 %336 }
 0x4af   : > { %813 = vrcp.f32 %v337_v11 }
 0x4b2   : > { %v342_v12 = vpop.permute.xlu1 %341 }
 0x4b3   : > { %v347_v13 = vsel %vm233_vm2, %v342_v12, 0 }
 0x4b4   : > { %749 = vmatpush3.bf16.msra.mxu0 %v347_v13 }
 0x4b5   : > { %760 = vmatprep.subr.bf16.mxu0 %v827_v0 }
 0x4b9   : > { %v814_v14 = vpop.eup %813 }
 0x4ba   : > { %v339_v15 = vmul.f32 %v814_v14, %v808_v61 }
 0x4bc   : > { %v340_v16 = vpack.c.bf16 %v339_v15, %v339_v15 }
 0x4be   : > { %751 = vmatmul.mubr.msk.bf16.vlgmr.msra.gmra.mrb[4].mxu0 %vm161_vm1, %v340_v16  ;;  %v561_v17 = vpop.xlane.xlu0 %560 }
 0x4bf   : > { %762 = vmatprep.mubr.msk.bf16.mxu0 %vm828_vm0, %v827_v0 }
 0x4c2   : > { %v454_v18 = vpop.permute.xlu0 %453 }
 0x4c3   : > { %v459_v2 = vsel %vm233_vm2, %v454_v18, 0 }
 0x4c4   : > { %761 = vmatpush3.bf16.msra.mxu0 %v459_v2 }
 0x4c5   : > { %772 = vmatprep.subr.bf16.mxu0 %v827_v0 }
 0x4e3   : > { %v449_v19 = vpop.xlane.xlu1 %448 }
 0x4e4   : > { %815 = vrcp.f32 %v449_v19 }
 0x4e5   : > { %817 = vrcp.f32 %v561_v17 }
 0x4e7   : > { %v566_v21 = vpop.permute.xlu1 %565 }
 0x4e8   : > { %v571_v23 = vsel %vm233_vm2, %v566_v21, 0 }
 0x4ee   : > { %v816_v20 = vpop.eup %815 }
 0x4ef   : > { %v451_v22 = vmul.f32 %v816_v20, %v812_v9  ;;  %v818_v25 = vpop.eup %817 }
 0x4f0   : > { %v563_v26 = vmul.f32 %v818_v25, %v810_v4 }
 0x4f1   : > { %v452_v24 = vpack.c.bf16 %v451_v22, %v451_v22 }
 0x4f2   : > { %v564_v27 = vpack.c.bf16 %v563_v26, %v563_v26 }
 0x4f3   : > { %763 = vmatmul.mubr.msk.bf16.vlgmr.msra.gmra.mrb[8].mxu0 %vm161_vm1, %v452_v24 }
 0x4f4   : > { %773 = vmatpush3.bf16.msra.mxu0 %v571_v23  ;;  %774 = vmatprep.mubr.msk.bf16.mxu0 %vm828_vm0, %v827_v0 }
 0x4fb   : > { %775 = vmatmul.mubr.msk.bf16.vlgmr.msra.gmra.mrb[12].mxu0 %vm161_vm1, %v564_v27 }
 0x591   : > { %v383_v28 = vpop.f32.mrb[4].mxu0 }
 0x592   : > { %614 = vrot.lane.b32.xlu1 %v383_v28, %s840_s29  ;;  %v752_v29 = vpop.f32.mrb[5].mxu0 }
 0x593   : > { %v386_v30 = vpop.f32.mrb[6].mxu0 }
 0x594   : > { %v753_v31 = vpop.f32.mrb[7].mxu0 }
 0x5c6   : > { %v495_v32 = vpop.f32.mrb[8].mxu0 }
 0x5c7   : > { %618 = vrot.lane.b32.xlu0 %v495_v32, %s841_s30  ;;  %v764_v34 = vpop.f32.mrb[9].mxu0 }
 0x5c8   : > { %v498_v35 = vpop.f32.mrb[10].mxu0 }
 0x5c9   : > { %v765_v36 = vpop.f32.mrb[11].mxu0 }
 0x5ce   : > { %v607_v37 = vpop.f32.mrb[12].mxu0 }
 0x5cf   : > { %622 = vrot.lane.b32.xlu1 %v607_v37, %s842_s3  ;;  %v776_v0 = vpop.f32.mrb[13].mxu0 }
 0x5d0   : > { %v610_v38 = vpop.f32.mrb[14].mxu0 }
 0x5d1   : > { %v777_v39 = vpop.f32.mrb[15].mxu0 }
 0x604   : > { %v615_v40 = vpop.permute.xlu1 %614 }
 0x605   : > { %v625_v42 = vsel %vm161_vm1, %v921_v33, %v615_v40 }
 0x639   : > { %v619_v41 = vpop.permute.xlu0 %618 }
 0x63a   : > { %v627_v43 = vsel %vm626_vm3, %v625_v42, %v619_v41 }
 0x641   : > { %v623_v44 = vpop.permute.xlu1 %622 }
 0x642   : > { %v629_v45 = vsel %vm628_vm4, %v627_v43, %v623_v44 }
 0x643   : > { %v630_v46 = vpack.c.bf16 %v629_v45, %v629_v45 }
 0x645   : > { %632 = vst.msk [vmem:[%s152_s6] sm:$0xf] %vm631_vm5, %v630_v46 }
 0x646 PF: > { %s12_s9 = sadd.s32 1, %s825_s9  }
 0x647   : > { %p9_p4 = scmp.ge.s32.totalorder %s12_s9, 4  }
 0x649   :  { %11 = sbr.rel (!%p9_p4) target bundleno = 1 (0x1), region = 61 }

// kernel: finetune_probe_forward.16
= control target key start
LH: loop header
LB: loop body
LE: loop exit
PB: predicated region body
PF: predicated region fallthrough
CT: control target
= control target key end

     0   :  { %v227_v0 = vmov 0.0   ;;  %vm228_vm0 = vmmov 0   ;;  %vm70_vm1 = vcmask 523264   ;;  %vm121_vm2 = vcmask 261120   ;;  %s301_s1 = inlined_call_operand.vmem [shape: bf16[64,32], index: 1, kind: input, shape index: {}]   ;;  %s302_s0 = inlined_call_operand.vmem [shape: bf16[16,64], index: 0, kind: input, shape index: {}]   ;;  %s303_s3 = inlined_call_operand.vmem [shape: bf16[16,32], index: 3, kind: input, shape index: {}]   ;;  %s304_s2 = inlined_call_operand.vmem [shape: f32[1,32], index: 2, kind: input, shape index: {}]   ;;  %s305_s4 = inlined_call_operand.vmem [shape: f32[1,32], index: 4, kind: input, shape index: {}]   ;;  %s306_s5 = inlined_call_operand.vmem [shape: f32[1,32], index: 5, kind: input, shape index: {}]   ;;  %s307_s6 = inlined_call_operand.vmem [shape: bf16[16,32], index: 6, kind: output, shape index: {}]  }
   0x1   :  { %204 = vmatprep.subr.bf16.mxu0 %v227_v0  ;;  %v218_v1 = vld [vmem:[%s301_s1] sm:$0xff]   ;;  %212 = vmatprep.mubr.msk.bf16.mxu0 %vm228_vm0, %v227_v0  ;;  %v219_v2 = vld [vmem:[%s301_s1 + $0x8] sm:$0xff]   ;;  %v220_v3 = vld [vmem:[%s301_s1 + $0x10] sm:$0xff]   ;;  %vm175_vm3 = vcmask 257024  }
   0x2   :  { %205 = vmatpush3.bf16.msra.mxu0 %v218_v1  ;;  %v221_v4 = vld [vmem:[%s301_s1 + $0x18] sm:$0xff]   ;;  %v222_v5 = vld [vmem:[%s302_s0] sm:$0xff]  }
   0x3   :  { %206 = vmatprep.subr.bf16.mxu0 %v227_v0  ;;  %v196_v6 = vld [vmem:[%s303_s3] sm:$0xff]  }
   0x4   :  { %v182_v7 = vld [vmem:[%s304_s2] ss:$0 sm:$0xff]  ;;  %v197_v8 = vunpack.c.l.bf16 %v196_v6  ;;  %v198_v12 = vunpack.c.h.bf16 %v196_v6 }
   0x5   :  { %v189_v37 = vld [vmem:[%s305_s4] ss:$0 sm:$0xff] }
   0x6   :  { %207 = vmatpush3.bf16.msra.mxu0 %v219_v2  ;;  %v190_v39 = vld [vmem:[%s306_s5] ss:$0 sm:$0xff] }
   0x7   :  { %208 = vmatprep.subr.bf16.mxu0 %v227_v0 }
   0xa   :  { %209 = vmatpush3.bf16.msra.mxu0 %v220_v3 }
   0xb   :  { %210 = vmatprep.subr.bf16.mxu0 %v227_v0 }
   0xe   :  { %211 = vmatpush3.bf16.msra.mxu0 %v221_v4 }
  0x11   :  { %213 = vmatmul.mubr.msk.bf16.vlgmr.msra.gmra.mrb[0].mxu0 %vm70_vm1, %v222_v5 }
  0xe4   :  { %v108_v9 = vpop.f32.mrb[0].mxu0 }
  0xe5   :  { %v109_v10 = vadd.f32 %v182_v7, %v108_v9  ;;  %v214_v11 = vpop.f32.mrb[1].mxu0 }
  0xe6   :  { %v111_v13 = vpop.f32.mrb[2].mxu0 }
  0xe7   :  { %v112_v14 = vadd.f32 %v182_v7, %v111_v13  ;;  %v215_v15 = vpop.f32.mrb[3].mxu0  ;;  %v119_v16 = vadd.f32 %v197_v8, %v109_v10 }
  0xe9   :  { %v122_v17 = vsel %vm121_vm2, %v119_v16, 0.0  ;;  %v120_v18 = vadd.f32 %v198_v12, %v112_v14 }
  0xea   :  { %123 = vadd.xlane.f32.xlu0 %v122_v17 }
  0xeb   :  { %v125_v19 = vsel %vm121_vm2, %v120_v18, 0.0 }
  0xee   :  { %126 = vadd.xlane.f32.xlu0 %v125_v19 }
 0x177   :  { %v124_v20 = vpop.xlane.xlu0 %123 }
 0x178   :  { %v129_v21 = vmul.f32 0.03125, %v124_v20 }
 0x17a   :  { %v131_v22 = vsub.f32 %v119_v16, %v129_v21 }
 0x17b   :  { %v127_v23 = vpop.xlane.xlu0 %126 }
 0x17c   :  { %v130_v24 = vmul.f32 0.03125, %v127_v23  ;;  %v133_v25 = vmul.f32 %v131_v22, %v131_v22 }
 0x17e   :  { %v132_v26 = vsub.f32 %v120_v18, %v130_v24  ;;  %v135_v27 = vsel %vm121_vm2, %v133_v25, 0.0 }
 0x17f   :  { %136 = vadd.xlane.f32.xlu1 %v135_v27 }
 0x180   :  { %v134_v28 = vmul.f32 %v132_v26, %v132_v26 }
 0x182   :  { %v138_v29 = vsel %vm121_vm2, %v134_v28, 0.0 }
 0x183   :  { %139 = vadd.xlane.f32.xlu1 %v138_v29 }
 0x20c   :  { %v137_v30 = vpop.xlane.xlu1 %136 }
 0x20d   :  { %v141_v31 = vmul.f32 0.03125, %v137_v30 }
 0x20f   :  { %v143_v32 = vadd.f32 1e-12, %v141_v31 }
 0x210   :  { %v140_v33 = vpop.xlane.xlu1 %139 }
 0x211   :  { %223 = vrsqrt.f32 %v143_v32  ;;  %v142_v34 = vmul.f32 0.03125, %v140_v33 }
 0x213   :  { %v144_v35 = vadd.f32 1e-12, %v142_v34 }
 0x215   :  { %225 = vrsqrt.f32 %v144_v35 }
 0x21b   :  { %v224_v36 = vpop.eup %223 }
 0x21c   :  { %v147_v38 = vmul.f32 %v224_v36, %v131_v22 }
 0x21e   :  { %v156_v40 = vmul.f32 %v189_v37, %v147_v38 }
 0x21f   :  { %v226_v41 = vpop.eup %225 }
 0x220   :  { %v165_v42 = vadd.f32 %v190_v39, %v156_v40  ;;  %v148_v43 = vmul.f32 %v226_v41, %v132_v26 }
 0x222   :  { %v193_v44 = vpack.c.bf16 %v165_v42, %v165_v42  ;;  %v157_v45 = vmul.f32 %v189_v37, %v148_v43 }
 0x224   :  { %176 = vst.msk [vmem:[%s307_s6] sm:$0xf] %vm175_vm3, %v193_v44  ;;  %v166_v46 = vadd.f32 %v190_v39, %v157_v45 }
 0x226   :  { %v194_v47 = vpack.c.bf16 %v166_v46, %v166_v46 }
 0x228   :  { %177 = vst.msk [vmem:[%s307_s6 + $0x4] sm:$0xf] %vm175_vm3, %v194_v47 }

// kernel: finetune_probe_forward.15
= control target key start
LH: loop header
LB: loop body
LE: loop exit
PB: predicated region body
PF: predicated region fallthrough
CT: control target
= control target key end

     0   :  { %v152_v0 = vmov 0.0   ;;  %vm153_vm0 = vmmov 0   ;;  %vm45_vm1 = vcmask 261120   ;;  %vm116_vm2 = vcmask 519168   ;;  %s192_s1 = inlined_call_operand.vmem [shape: bf16[32,64], index: 1, kind: input, shape index: {}]   ;;  %s193_s0 = inlined_call_operand.vmem [shape: bf16[16,32], index: 0, kind: input, shape index: {}]   ;;  %s194_s2 = inlined_call_operand.vmem [shape: f32[1,64], index: 2, kind: input, shape index: {}]   ;;  %s195_s3 = inlined_call_operand.vmem [shape: bf16[16,64], index: 3, kind: output, shape index: {}]  }
   0x1   :  { %135 = vmatprep.subr.bf16.mxu0 %v152_v0  ;;  %v145_v1 = vld [vmem:[%s192_s1] sm:$0xff]   ;;  %139 = vmatprep.mubr.msk.bf16.mxu0 %vm153_vm0, %v152_v0  ;;  %v146_v2 = vld [vmem:[%s192_s1 + $0x8] sm:$0xff]  }
   0x2   :  { %136 = vmatpush3.bf16.msra.mxu0 %v145_v1  ;;  %v147_v3 = vld [vmem:[%s193_s0] sm:$0xff]  }
   0x3   :  { %137 = vmatprep.subr.bf16.mxu0 %v152_v0  ;;  %v123_v4 = vld [vmem:[%s194_s2] ss:$0 sm:$0xff] }
   0x6   :  { %138 = vmatpush3.bf16.msra.mxu0 %v146_v2 }
   0x9   :  { %140 = vmatmul.mubr.msk.bf16.vlgmr.msra.gmra.mrb[0].mxu0 %vm45_vm1, %v147_v3 }
  0xdc   :  { %v83_v5 = vpop.f32.mrb[0].mxu0 }
  0xdd   :  { %v84_v6 = vadd.f32 %v123_v4, %v83_v5  ;;  %v141_v7 = vpop.f32.mrb[1].mxu0 }
  0xde   :  { %v86_v8 = vpop.f32.mrb[2].mxu0 }
  0xdf   :  { %v90_v9 = vmul.f32 %v84_v6, %v84_v6  ;;  %v87_v10 = vadd.f32 %v123_v4, %v86_v8  ;;  %v142_v11 = vpop.f32.mrb[3].mxu0 }
  0xe1   :  { %v92_v12 = vmul.f32 %v90_v9, %v84_v6  ;;  %v91_v13 = vmul.f32 %v87_v10, %v87_v10 }
  0xe3   :  { %v94_v14 = vmul.f32 0.044715, %v92_v12  ;;  %v93_v15 = vmul.f32 %v91_v13, %v87_v10 }
  0xe5   :  { %v96_v16 = vadd.f32 %v94_v14, %v84_v6  ;;  %v95_v17 = vmul.f32 0.044715, %v93_v15 }
  0xe7   :  { %v98_v18 = vmul.f32 0.7978846, %v96_v16  ;;  %v97_v19 = vadd.f32 %v95_v17, %v87_v10 }
  0xe9   :  { %148 = vtanh.f32 %v98_v18  ;;  %v99_v20 = vmul.f32 0.7978846, %v97_v19 }
  0xeb   :  { %150 = vtanh.f32 %v99_v20 }
  0xf3   :  { %v149_v21 = vpop.eup %148 }
  0xf4   :  { %v102_v22 = vadd.f32 1.0, %v149_v21 }
  0xf5   :  { %v151_v23 = vpop.eup %150 }
  0xf6   :  { %v104_v24 = vmul.f32 0.5, %v102_v22  ;;  %v103_v25 = vadd.f32 1.0, %v151_v23 }
  0xf8   :  { %v106_v26 = vmul.f32 %v104_v24, %v84_v6  ;;  %v105_v27 = vmul.f32 0.5, %v103_v25 }
  0xfa   :  { %v130_v28 = vpack.c.bf16 %v106_v26, %v106_v26  ;;  %v107_v29 = vmul.f32 %v105_v27, %v87_v10 }
  0xfc   :  { %117 = vst.msk [vmem:[%s195_s3] sm:$0xf] %vm116_vm2, %v130_v28  ;;  %v131_v30 = vpack.c.bf16 %v107_v29, %v107_v29 }
  0xfe   :  { %118 = vst.msk [vmem:[%s195_s3 + $0x4] sm:$0xf] %vm116_vm2, %v131_v30 }

</bundles_post_ra>
